<compile_context>
chip_gen: v7x
topology: tpu7x:2x2x1
jax: 0.10.0
libtpu: 0.0.40
codegen_flags: <defaults>
</compile_context>

<pallas_src>
import math
import functools

import jax
import jax.numpy as jnp
import numpy as np
from jax.experimental import pallas as pl
from jax.experimental.pallas import tpu as pltpu

LANE = 128


def _round_up(n, m):
    return ((n + m - 1) // m) * m


def _mish(v):
    # x * tanh(softplus(x)).  tanh(softplus(v)) == n / (n + 2) with
    # n = e * (e + 2), e = exp(v).  Clamping v at 20 keeps n finite and the
    # result equal to v (to f32 precision) in the saturated region.
    # One EUP exp + one approximate EUP reciprocal instead of exp+log1p+tanh.
    e = jnp.exp(jnp.minimum(v, 20.0))
    n = e * (e + 2.0)
    return v * n * pl.reciprocal(n + 2.0, approx=True)


# ----------------------------- Pallas kernel --------------------------------

def _mlp_kernel(ht_pad, t_pad, h_pad, a_pad,
                inp_ref, wt1_ref, wt2_ref, w1c_ref, w1t_ref,
                w2_ref, w3_ref, wf_ref, bias_ref, out_ref):
    f32 = jnp.float32

    def dot(a, w_ref):
        w = w_ref[...]
        # operands in the (bf16) weight dtype, f32 accumulation on the MXU
        return jnp.dot(a.astype(w.dtype), w, preferred_element_type=f32)

    bias = bias_ref[...]                       # (8, maxw) f32; 128-aligned slices
    bt1 = bias[0:1, :ht_pad]
    bt2 = bias[1:2, :t_pad]
    b1 = bias[2:3, :h_pad]
    b2 = bias[3:4, :h_pad]
    b3 = bias[4:5, :h_pad]
    bf = bias[5:6, :a_pad]

    inp = inp_ref[...]                         # (tb, in_pad): [sin|cos|x|state|0..]

    # time MLP: Linear(t_dim -> 2*t_dim) -> Mish -> Linear(2*t_dim -> t_dim).
    # The sin/cos features occupy rows [0, t_dim) of wt1; all other rows are 0.
    t = _mish(dot(inp, wt1_ref) + bt1)         # (tb, ht_pad)
    t = dot(t, wt2_ref) + bt2                  # (tb, t_pad)

    # mid layers: concat([x, t, state]) @ W1 fused as two dots with pre-split
    # row blocks (x/state rows read straight from the packed input slab).
    h = _mish(dot(inp, w1c_ref) + dot(t, w1t_ref) + b1)
    h = _mish(dot(h, w2_ref) + b2)
    h = _mish(dot(h, w3_ref) + b3)

    # final layer; lane-dense unmasked store
    out_ref[...] = (dot(h, wf_ref) + bf).astype(out_ref.dtype)


# ----------------------------- Param preparation -----------------------------

def prepare_params(params, *, state_dim, action_dim, hidden_dim, t_dim,
                   dot_dtype=jnp.bfloat16):
    """Pre-split / zero-pad weights to lane-dense shapes (done once).

    `dot_dtype` is the dtype of the MXU operands AND of the streamed
    activations; accumulation and elementwise math stay f32.  bf16 is the
    recommended default on v5e/v6e/v7x; pass jnp.float32 for exact f32 math.

    Padding granularity is 128.  If hidden_dim is ever scaled into the
    compute-bound regime on v6e/v7x, padding hidden to a multiple of 256
    (their MXUs are 256x256) is the better layout; 128 is right on v5e.
    """
    half = t_dim // 2
    assert t_dim % 2 == 0 and half > 1, "t_dim must be even and >= 4"

    in_total = t_dim + action_dim + state_dim
    in_pad = _round_up(in_total, LANE)
    ht_pad = _round_up(2 * t_dim, LANE)
    t_pad = _round_up(t_dim, LANE)
    h_pad = _round_up(hidden_dim, LANE)
    a_pad = _round_up(action_dim, LANE)
    maxw = max(ht_pad, t_pad, h_pad, a_pad)

    def embed(rows, cols, pieces):
        w = jnp.zeros((rows, cols), jnp.float32)
        for r0, blk in pieces:
            w = w.at[r0:r0 + blk.shape[0], :blk.shape[1]].set(blk)
        return w.astype(dot_dtype)

    a, td = action_dim, t_dim
    w1 = params["w1"]
    p = {
        # time-MLP layer 1: rows [0, t_dim) act on the packed sin/cos columns
        "wt1": embed(in_pad, ht_pad, [(0, params["wt1"])]),
        "wt2": embed(ht_pad, t_pad, [(0, params["wt2"])]),
        # W1 split: x rows sit at packed cols [t_dim, t_dim+a), state rows at
        # [t_dim+a, ...); the time-MLP output t uses its own (t_pad, h) block.
        "w1c": embed(in_pad, h_pad, [(td, w1[:a]), (td + a, w1[a + td:])]),
        "w1t": embed(t_pad, h_pad, [(0, w1[a:a + td])]),
        "w2": embed(h_pad, h_pad, [(0, params["w2"])]),
        "w3": embed(h_pad, h_pad, [(0, params["w3"])]),
        "wf": embed(h_pad, a_pad, [(0, params["wf"])]),
    }

    # pack all biases into one (8, maxw) slab (one stream instead of six)
    bias = jnp.zeros((8, maxw), jnp.float32)
    for row, (name, width) in enumerate(
            [("bt1", 2 * td), ("bt2", td), ("b1", hidden_dim),
             ("b2", hidden_dim), ("b3", hidden_dim), ("bf", action_dim)]):
        bias = bias.at[row, :width].set(params[name][0])
    p["bias"] = bias                      # biases stay f32 (f32 elementwise math)

    dims = dict(in_pad=in_pad, ht_pad=ht_pad, t_pad=t_pad, h_pad=h_pad,
                a_pad=a_pad, in_total=in_total, half=half, t_dim=t_dim,
                action_dim=action_dim, state_dim=state_dim,
                stream_dtype=dot_dtype)
    return p, dims


# ----------------------------- Python wrapper --------------------------------

def mlp_forward(x, time, state, padded_params, dims, *, block_b=128,
                single_buffer_weights=True, vmem_limit_bytes=None):
    B = x.shape[0]
    half = dims["half"]
    action_dim, state_dim = dims["action_dim"], dims["state_dim"]
    in_pad, a_pad = dims["in_pad"], dims["a_pad"]
    stream_dtype = dims["stream_dtype"]
    assert x.shape[1] == action_dim and state.shape[1] == state_dim

    # batch padding granularity: one full sublane tile of the streamed dtype
    gran = 8 * max(1, 4 // jnp.dtype(stream_dtype).itemsize)
    b_pad = _round_up(max(B, gran), gran)
    tb = min(block_b, b_pad)
    # v7x has 2 TensorCores: make sure the "parallel" batch grid has >= 2
    # steps whenever the batch is big enough to split.
    if b_pad >= 2 * gran:
        tb = min(tb, _round_up(b_pad // 2, gran))
    b_pad = _round_up(b_pad, tb)
    grid = (b_pad // tb,)

    # ---- single lane-dense activation slab: [sin | cos | x | state | 0...] --
    # (the time features are baked into the combined input; sin/cos of a
    #  (B, t_dim/2) array is negligible wrapper work and removes the
    #  lane-sparse time column plus the per-grid-step embedding EUP work)
    scale = math.log(10000.0) / (half - 1)
    freqs = jnp.exp(jnp.arange(half, dtype=jnp.float32) * -scale)
    ang = time.astype(jnp.float32)[:, None] * freqs[None, :]
    feat = jnp.concatenate(
        [jnp.sin(ang), jnp.cos(ang),
         x.astype(jnp.float32), state.astype(jnp.float32)], axis=1)
    feat = jnp.pad(feat, ((0, b_pad - B), (0, in_pad - feat.shape[1])))
    feat = feat.astype(stream_dtype)

    kernel = functools.partial(_mlp_kernel, dims["ht_pad"], dims["t_pad"],
                               dims["h_pad"], a_pad)

    weight_order = ["wt1", "wt2", "w1c", "w1t", "w2", "w3", "wf", "bias"]
    weights = [padded_params[k] for k in weight_order]

    def act_spec(cols):
        return pl.BlockSpec((tb, cols), lambda i: (i, 0))

    def run(single_buffer):
        def weight_spec(arr):
            # whole array as one block with constant index -> VMEM-resident;
            # single-buffer it to halve resident weight VMEM (v7x: 64 MiB).
            if single_buffer:
                return pl.BlockSpec(arr.shape, lambda i: (0, 0),
                                    pipeline_mode=pl.Buffered(1))
            return pl.BlockSpec(arr.shape, lambda i: (0, 0))

        call = pl.pallas_call(
            kernel,
            out_shape=jax.ShapeDtypeStruct((b_pad, a_pad), stream_dtype),
            grid_spec=pltpu.PrefetchScalarGridSpec(
                num_scalar_prefetch=0,
                grid=grid,
                in_specs=[act_spec(in_pad)] + [weight_spec(w) for w in weights],
                out_specs=act_spec(a_pad),
            ),
            compiler_params=pltpu.CompilerParams(
                dimension_semantics=("parallel",),
                # set explicitly when hidden_dim is scaled up (v7x: 64 MiB
                # physical VMEM, 32 MiB default scoped limit)
                vmem_limit_bytes=vmem_limit_bytes),
        )
        return jax.block_until_ready(call(feat, *weights))

    if single_buffer_weights:
        try:
            out = run(True)
        except Exception:   # pl.Buffered(1) unsupported on this build: fallback
            out = run(False)
    else:
        out = run(False)

    return out[:B, :action_dim].astype(jnp.float32)


# ----------------------------- Parameter init --------------------------------

def init_params(key, state_dim, action_dim, hidden_dim, t_dim):
    """Synthetic weights stored as (in, out); biases as (1, out)."""
    input_dim = state_dim + action_dim + t_dim
    shapes = {
        "wt1": (t_dim, 2 * t_dim), "bt1": (1, 2 * t_dim),
        "wt2": (2 * t_dim, t_dim), "bt2": (1, t_dim),
        "w1": (input_dim, hidden_dim), "b1": (1, hidden_dim),
        "w2": (hidden_dim, hidden_dim), "b2": (1, hidden_dim),
        "w3": (hidden_dim, hidden_dim), "b3": (1, hidden_dim),
        "wf": (hidden_dim, action_dim), "bf": (1, action_dim),
    }
    params = {}
    keys = jax.random.split(key, len(shapes))
    for k, (name, shape) in zip(keys, shapes.items()):
        fan_in = shape[0] if name.startswith("w") else shape[1]
        bound = 1.0 / math.sqrt(max(fan_in, 1))
        params[name] = jax.random.uniform(k, shape, jnp.float32, -bound, bound)
    return params


# ----------------------------- Reference (plain JAX) -------------------------

def sinusoidal_pos_emb(time, dim):
    half_dim = dim // 2
    scale = math.log(10000.0) / (half_dim - 1)
    freqs = jnp.exp(jnp.arange(half_dim, dtype=jnp.float32) * -scale)
    emb = time[:, None].astype(jnp.float32) * freqs[None, :]
    return jnp.concatenate([jnp.sin(emb), jnp.cos(emb)], axis=-1)


def mlp_reference(x, time, state, params, *, t_dim):
    def mish(v):
        return v * jnp.tanh(jnp.log1p(jnp.exp(v)))

    emb = sinusoidal_pos_emb(time, t_dim)
    t = mish(emb @ params["wt1"] + params["bt1"]) @ params["wt2"] + params["bt2"]
    h = jnp.concatenate([x, t, state], axis=1)
    h = mish(h @ params["w1"] + params["b1"])
    h = mish(h @ params["w2"] + params["b2"])
    h = mish(h @ params["w3"] + params["b3"])
    return h @ params["wf"] + params["bf"]


# ----------------------------------- main -------------------------------------

if __name__ == "__main__":
    state_dim, action_dim, hidden_dim, t_dim = 17, 6, 32, 16
    batch = 2

    key = jax.random.PRNGKey(0)
    k_p, k_x, k_t, k_s = jax.random.split(key, 4)

    params = init_params(k_p, state_dim, action_dim, hidden_dim, t_dim)
    x = jax.random.normal(k_x, (batch, action_dim), jnp.float32)
    time = jax.random.uniform(k_t, (batch,), jnp.float32, 0.0, 100.0)
    state = jax.random.normal(k_s, (batch, state_dim), jnp.float32)

    ref = mlp_reference(x, time, state, params, t_dim=t_dim)

    # Default path: bf16 weights + bf16 streamed activations (recommended on
    # v5e/v6e/v7x), f32 accumulation / elementwise.  bf16-appropriate tolerance.
    p_bf16, d_bf16 = prepare_params(params, state_dim=state_dim,
                                    action_dim=action_dim,
                                    hidden_dim=hidden_dim, t_dim=t_dim)
    out_bf16 = jax.block_until_ready(
        mlp_forward(x, time, state, p_bf16, d_bf16))
    np.testing.assert_allclose(np.asarray(out_bf16), np.asarray(ref),
                               rtol=5e-2, atol=5e-2)

    # f32 path for a tight structural check against the f32 reference.
    p_f32, d_f32 = prepare_params(params, state_dim=state_dim,
                                  action_dim=action_dim,
                                  hidden_dim=hidden_dim, t_dim=t_dim,
                                  dot_dtype=jnp.float32)
    out_f32 = jax.block_until_ready(
        mlp_forward(x, time, state, p_f32, d_f32))
    np.testing.assert_allclose(np.asarray(out_f32), np.asarray(ref),
                               rtol=5e-3, atol=5e-3)

    print("KERNEL_OK")
</pallas_src>

<mosaic_0001>
module attributes {stable_mosaic.version = 11 : i64} {
  func.func @_mlp_kernel(%arg0: i32, %arg1: memref<16x128xbf16, #tpu.memory_space<vmem>>, %arg2: memref<128x128xbf16, #tpu.memory_space<vmem>>, %arg3: memref<128x128xbf16, #tpu.memory_space<vmem>>, %arg4: memref<128x128xbf16, #tpu.memory_space<vmem>>, %arg5: memref<128x128xbf16, #tpu.memory_space<vmem>>, %arg6: memref<128x128xbf16, #tpu.memory_space<vmem>>, %arg7: memref<128x128xbf16, #tpu.memory_space<vmem>>, %arg8: memref<128x128xbf16, #tpu.memory_space<vmem>>, %arg9: memref<8x128xf32, #tpu.memory_space<vmem>>, %arg10: memref<16x128xbf16, #tpu.memory_space<vmem>>) attributes {dimension_semantics = [#tpu.dimension_semantics<parallel>], iteration_bounds = array<i64: 1>, scalar_prefetch = 0 : i64, scratch_operands = 0 : i64, tpu.core_type = #tpu.core_type<tc>, window_params = [{transform_indices = @transform_0, window_bounds = array<i64: 16, 128>}, {pipeline_mode = #tpu.pipeline_mode<synchronous>, transform_indices = @transform_1, window_bounds = array<i64: 128, 128>}, {pipeline_mode = #tpu.pipeline_mode<synchronous>, transform_indices = @transform_2, window_bounds = array<i64: 128, 128>}, {pipeline_mode = #tpu.pipeline_mode<synchronous>, transform_indices = @transform_3, window_bounds = array<i64: 128, 128>}, {pipeline_mode = #tpu.pipeline_mode<synchronous>, transform_indices = @transform_4, window_bounds = array<i64: 128, 128>}, {pipeline_mode = #tpu.pipeline_mode<synchronous>, transform_indices = @transform_5, window_bounds = array<i64: 128, 128>}, {pipeline_mode = #tpu.pipeline_mode<synchronous>, transform_indices = @transform_6, window_bounds = array<i64: 128, 128>}, {pipeline_mode = #tpu.pipeline_mode<synchronous>, transform_indices = @transform_7, window_bounds = array<i64: 128, 128>}, {pipeline_mode = #tpu.pipeline_mode<synchronous>, transform_indices = @transform_8, window_bounds = array<i64: 8, 128>}, {transform_indices = @transform_9, window_bounds = array<i64: 16, 128>}]} {
    %c0 = arith.constant 0 : index
    %c0_0 = arith.constant 0 : index
    %0 = vector.load %arg9[%c0, %c0_0] : memref<8x128xf32, #tpu.memory_space<vmem>>, vector<8x128xf32>
    %1 = vector.extract_strided_slice %0 {offsets = [0, 0], sizes = [1, 128], strides = [1, 1]} : vector<8x128xf32> to vector<1x128xf32>
    %2 = vector.extract_strided_slice %0 {offsets = [1, 0], sizes = [1, 128], strides = [1, 1]} : vector<8x128xf32> to vector<1x128xf32>
    %3 = vector.extract_strided_slice %0 {offsets = [2, 0], sizes = [1, 128], strides = [1, 1]} : vector<8x128xf32> to vector<1x128xf32>
    %4 = vector.extract_strided_slice %0 {offsets = [3, 0], sizes = [1, 128], strides = [1, 1]} : vector<8x128xf32> to vector<1x128xf32>
    %5 = vector.extract_strided_slice %0 {offsets = [4, 0], sizes = [1, 128], strides = [1, 1]} : vector<8x128xf32> to vector<1x128xf32>
    %6 = vector.extract_strided_slice %0 {offsets = [5, 0], sizes = [1, 128], strides = [1, 1]} : vector<8x128xf32> to vector<1x128xf32>
    %c0_1 = arith.constant 0 : index
    %c0_2 = arith.constant 0 : index
    %7 = vector.load %arg1[%c0_1, %c0_2] : memref<16x128xbf16, #tpu.memory_space<vmem>>, vector<16x128xbf16>
    %c0_3 = arith.constant 0 : index
    %c0_4 = arith.constant 0 : index
    %8 = vector.load %arg2[%c0_3, %c0_4] : memref<128x128xbf16, #tpu.memory_space<vmem>>, vector<128x128xbf16>
    %cst = arith.constant dense<0.000000e+00> : vector<16x128xf32>
    %9 = tpu.matmul %7, %8, %cst {dimension_numbers = #tpu.dot_dimension_numbers<[1], [0], [0], [1], [0, 0, 1, 1], [], []>} : vector<16x128xbf16>, vector<128x128xbf16>, vector<16x128xf32> -> vector<16x128xf32>
    %10 = vector.broadcast %1 : vector<1x128xf32> to vector<16x128xf32>
    %11 = arith.addf %9, %10 : vector<16x128xf32>
    %cst_5 = arith.constant 2.000000e+01 : f32
    %12 = vector.broadcast %cst_5 : f32 to vector<16x128xf32>
    %13 = arith.minimumf %11, %12 : vector<16x128xf32>
    %14 = math.exp %13 : vector<16x128xf32>
    %cst_6 = arith.constant 2.000000e+00 : f32
    %15 = vector.broadcast %cst_6 : f32 to vector<16x128xf32>
    %16 = arith.addf %14, %15 : vector<16x128xf32>
    %17 = arith.mulf %14, %16 : vector<16x128xf32>
    %18 = arith.mulf %11, %17 : vector<16x128xf32>
    %cst_7 = arith.constant 2.000000e+00 : f32
    %19 = vector.broadcast %cst_7 : f32 to vector<16x128xf32>
    %20 = arith.addf %17, %19 : vector<16x128xf32>
    %21 = tpu.reciprocal %20 {approx = true} : vector<16x128xf32> -> vector<16x128xf32>
    %22 = arith.mulf %18, %21 : vector<16x128xf32>
    %c0_8 = arith.constant 0 : index
    %c0_9 = arith.constant 0 : index
    %23 = vector.load %arg3[%c0_8, %c0_9] : memref<128x128xbf16, #tpu.memory_space<vmem>>, vector<128x128xbf16>
    %24 = arith.truncf %22 : vector<16x128xf32> to vector<16x128xbf16>
    %cst_10 = arith.constant dense<0.000000e+00> : vector<16x128xf32>
    %25 = tpu.matmul %24, %23, %cst_10 {dimension_numbers = #tpu.dot_dimension_numbers<[1], [0], [0], [1], [0, 0, 1, 1], [], []>} : vector<16x128xbf16>, vector<128x128xbf16>, vector<16x128xf32> -> vector<16x128xf32>
    %26 = vector.broadcast %2 : vector<1x128xf32> to vector<16x128xf32>
    %27 = arith.addf %25, %26 : vector<16x128xf32>
    %c0_11 = arith.constant 0 : index
    %c0_12 = arith.constant 0 : index
    %28 = vector.load %arg4[%c0_11, %c0_12] : memref<128x128xbf16, #tpu.memory_space<vmem>>, vector<128x128xbf16>
    %cst_13 = arith.constant dense<0.000000e+00> : vector<16x128xf32>
    %29 = tpu.matmul %7, %28, %cst_13 {dimension_numbers = #tpu.dot_dimension_numbers<[1], [0], [0], [1], [0, 0, 1, 1], [], []>} : vector<16x128xbf16>, vector<128x128xbf16>, vector<16x128xf32> -> vector<16x128xf32>
    %c0_14 = arith.constant 0 : index
    %c0_15 = arith.constant 0 : index
    %30 = vector.load %arg5[%c0_14, %c0_15] : memref<128x128xbf16, #tpu.memory_space<vmem>>, vector<128x128xbf16>
    %31 = arith.truncf %27 : vector<16x128xf32> to vector<16x128xbf16>
    %cst_16 = arith.constant dense<0.000000e+00> : vector<16x128xf32>
    %32 = tpu.matmul %31, %30, %cst_16 {dimension_numbers = #tpu.dot_dimension_numbers<[1], [0], [0], [1], [0, 0, 1, 1], [], []>} : vector<16x128xbf16>, vector<128x128xbf16>, vector<16x128xf32> -> vector<16x128xf32>
    %33 = arith.addf %29, %32 : vector<16x128xf32>
    %34 = vector.broadcast %3 : vector<1x128xf32> to vector<16x128xf32>
    %35 = arith.addf %33, %34 : vector<16x128xf32>
    %cst_17 = arith.constant 2.000000e+01 : f32
    %36 = vector.broadcast %cst_17 : f32 to vector<16x128xf32>
    %37 = arith.minimumf %35, %36 : vector<16x128xf32>
    %38 = math.exp %37 : vector<16x128xf32>
    %cst_18 = arith.constant 2.000000e+00 : f32
    %39 = vector.broadcast %cst_18 : f32 to vector<16x128xf32>
    %40 = arith.addf %38, %39 : vector<16x128xf32>
    %41 = arith.mulf %38, %40 : vector<16x128xf32>
    %42 = arith.mulf %35, %41 : vector<16x128xf32>
    %cst_19 = arith.constant 2.000000e+00 : f32
    %43 = vector.broadcast %cst_19 : f32 to vector<16x128xf32>
    %44 = arith.addf %41, %43 : vector<16x128xf32>
    %45 = tpu.reciprocal %44 {approx = true} : vector<16x128xf32> -> vector<16x128xf32>
    %46 = arith.mulf %42, %45 : vector<16x128xf32>
    %c0_20 = arith.constant 0 : index
    %c0_21 = arith.constant 0 : index
    %47 = vector.load %arg6[%c0_20, %c0_21] : memref<128x128xbf16, #tpu.memory_space<vmem>>, vector<128x128xbf16>
    %48 = arith.truncf %46 : vector<16x128xf32> to vector<16x128xbf16>
    %cst_22 = arith.constant dense<0.000000e+00> : vector<16x128xf32>
    %49 = tpu.matmul %48, %47, %cst_22 {dimension_numbers = #tpu.dot_dimension_numbers<[1], [0], [0], [1], [0, 0, 1, 1], [], []>} : vector<16x128xbf16>, vector<128x128xbf16>, vector<16x128xf32> -> vector<16x128xf32>
    %50 = vector.broadcast %4 : vector<1x128xf32> to vector<16x128xf32>
    %51 = arith.addf %49, %50 : vector<16x128xf32>
    %cst_23 = arith.constant 2.000000e+01 : f32
    %52 = vector.broadcast %cst_23 : f32 to vector<16x128xf32>
    %53 = arith.minimumf %51, %52 : vector<16x128xf32>
    %54 = math.exp %53 : vector<16x128xf32>
    %cst_24 = arith.constant 2.000000e+00 : f32
    %55 = vector.broadcast %cst_24 : f32 to vector<16x128xf32>
    %56 = arith.addf %54, %55 : vector<16x128xf32>
    %57 = arith.mulf %54, %56 : vector<16x128xf32>
    %58 = arith.mulf %51, %57 : vector<16x128xf32>
    %cst_25 = arith.constant 2.000000e+00 : f32
    %59 = vector.broadcast %cst_25 : f32 to vector<16x128xf32>
    %60 = arith.addf %57, %59 : vector<16x128xf32>
    %61 = tpu.reciprocal %60 {approx = true} : vector<16x128xf32> -> vector<16x128xf32>
    %62 = arith.mulf %58, %61 : vector<16x128xf32>
    %c0_26 = arith.constant 0 : index
    %c0_27 = arith.constant 0 : index
    %63 = vector.load %arg7[%c0_26, %c0_27] : memref<128x128xbf16, #tpu.memory_space<vmem>>, vector<128x128xbf16>
    %64 = arith.truncf %62 : vector<16x128xf32> to vector<16x128xbf16>
    %cst_28 = arith.constant dense<0.000000e+00> : vector<16x128xf32>
    %65 = tpu.matmul %64, %63, %cst_28 {dimension_numbers = #tpu.dot_dimension_numbers<[1], [0], [0], [1], [0, 0, 1, 1], [], []>} : vector<16x128xbf16>, vector<128x128xbf16>, vector<16x128xf32> -> vector<16x128xf32>
    %66 = vector.broadcast %5 : vector<1x128xf32> to vector<16x128xf32>
    %67 = arith.addf %65, %66 : vector<16x128xf32>
    %cst_29 = arith.constant 2.000000e+01 : f32
    %68 = vector.broadcast %cst_29 : f32 to vector<16x128xf32>
    %69 = arith.minimumf %67, %68 : vector<16x128xf32>
    %70 = math.exp %69 : vector<16x128xf32>
    %cst_30 = arith.constant 2.000000e+00 : f32
    %71 = vector.broadcast %cst_30 : f32 to vector<16x128xf32>
    %72 = arith.addf %70, %71 : vector<16x128xf32>
    %73 = arith.mulf %70, %72 : vector<16x128xf32>
    %74 = arith.mulf %67, %73 : vector<16x128xf32>
    %cst_31 = arith.constant 2.000000e+00 : f32
    %75 = vector.broadcast %cst_31 : f32 to vector<16x128xf32>
    %76 = arith.addf %73, %75 : vector<16x128xf32>
    %77 = tpu.reciprocal %76 {approx = true} : vector<16x128xf32> -> vector<16x128xf32>
    %78 = arith.mulf %74, %77 : vector<16x128xf32>
    %c0_32 = arith.constant 0 : index
    %c0_33 = arith.constant 0 : index
    %79 = vector.load %arg8[%c0_32, %c0_33] : memref<128x128xbf16, #tpu.memory_space<vmem>>, vector<128x128xbf16>
    %80 = arith.truncf %78 : vector<16x128xf32> to vector<16x128xbf16>
    %cst_34 = arith.constant dense<0.000000e+00> : vector<16x128xf32>
    %81 = tpu.matmul %80, %79, %cst_34 {dimension_numbers = #tpu.dot_dimension_numbers<[1], [0], [0], [1], [0, 0, 1, 1], [], []>} : vector<16x128xbf16>, vector<128x128xbf16>, vector<16x128xf32> -> vector<16x128xf32>
    %82 = vector.broadcast %6 : vector<1x128xf32> to vector<16x128xf32>
    %83 = arith.addf %81, %82 : vector<16x128xf32>
    %84 = arith.truncf %83 : vector<16x128xf32> to vector<16x128xbf16>
    %c0_35 = arith.constant 0 : index
    %c0_36 = arith.constant 0 : index
    %85 = vector.load %arg10[%c0_35, %c0_36] : memref<16x128xbf16, #tpu.memory_space<vmem>>, vector<16x128xbf16>
    tpu.vector_store %arg10[%c0_35, %c0_36], %84 {strides = array<i32>} : memref<16x128xbf16, #tpu.memory_space<vmem>>, vector<16x128xbf16>,
    return
  }
  func.func @transform_0(%arg0: i32) -> (i32, i32) {
    %c0_i32 = arith.constant 0 : i32
    %c0_i32_0 = arith.constant 0 : i32
    return %arg0, %c0_i32 : i32, i32
  }
  func.func @transform_1(%arg0: i32) -> (i32, i32) {
    %c0_i32 = arith.constant 0 : i32
    %c0_i32_0 = arith.constant 0 : i32
    %c0_i32_1 = arith.constant 0 : i32
    return %c0_i32, %c0_i32_0 : i32, i32
  }
  func.func @transform_2(%arg0: i32) -> (i32, i32) {
    %c0_i32 = arith.constant 0 : i32
    %c0_i32_0 = arith.constant 0 : i32
    %c0_i32_1 = arith.constant 0 : i32
    return %c0_i32, %c0_i32_0 : i32, i32
  }
  func.func @transform_3(%arg0: i32) -> (i32, i32) {
    %c0_i32 = arith.constant 0 : i32
    %c0_i32_0 = arith.constant 0 : i32
    %c0_i32_1 = arith.constant 0 : i32
    return %c0_i32, %c0_i32_0 : i32, i32
  }
  func.func @transform_4(%arg0: i32) -> (i32, i32) {
    %c0_i32 = arith.constant 0 : i32
    %c0_i32_0 = arith.constant 0 : i32
    %c0_i32_1 = arith.constant 0 : i32
    return %c0_i32, %c0_i32_0 : i32, i32
  }
  func.func @transform_5(%arg0: i32) -> (i32, i32) {
    %c0_i32 = arith.constant 0 : i32
    %c0_i32_0 = arith.constant 0 : i32
    %c0_i32_1 = arith.constant 0 : i32
    return %c0_i32, %c0_i32_0 : i32, i32
  }
  func.func @transform_6(%arg0: i32) -> (i32, i32) {
    %c0_i32 = arith.constant 0 : i32
    %c0_i32_0 = arith.constant 0 : i32
    %c0_i32_1 = arith.constant 0 : i32
    return %c0_i32, %c0_i32_0 : i32, i32
  }
  func.func @transform_7(%arg0: i32) -> (i32, i32) {
    %c0_i32 = arith.constant 0 : i32
    %c0_i32_0 = arith.constant 0 : i32
    %c0_i32_1 = arith.constant 0 : i32
    return %c0_i32, %c0_i32_0 : i32, i32
  }
  func.func @transform_8(%arg0: i32) -> (i32, i32) {
    %c0_i32 = arith.constant 0 : i32
    %c0_i32_0 = arith.constant 0 : i32
    %c0_i32_1 = arith.constant 0 : i32
    return %c0_i32, %c0_i32_0 : i32, i32
  }
  func.func @transform_9(%arg0: i32) -> (i32, i32) {
    %c0_i32 = arith.constant 0 : i32
    %c0_i32_0 = arith.constant 0 : i32
    return %arg0, %c0_i32 : i32, i32
  }
}

module attributes {stable_mosaic.version = 11 : i64} {
  func.func @_mlp_kernel(%arg0: i32, %arg1: memref<16x128xbf16, #tpu.memory_space<vmem>>, %arg2: memref<128x128xbf16, #tpu.memory_space<vmem>>, %arg3: memref<128x128xbf16, #tpu.memory_space<vmem>>, %arg4: memref<128x128xbf16, #tpu.memory_space<vmem>>, %arg5: memref<128x128xbf16, #tpu.memory_space<vmem>>, %arg6: memref<128x128xbf16, #tpu.memory_space<vmem>>, %arg7: memref<128x128xbf16, #tpu.memory_space<vmem>>, %arg8: memref<128x128xbf16, #tpu.memory_space<vmem>>, %arg9: memref<8x128xf32, #tpu.memory_space<vmem>>, %arg10: memref<16x128xbf16, #tpu.memory_space<vmem>>) attributes {dimension_semantics = [#tpu.dimension_semantics<parallel>], iteration_bounds = array<i64: 1>, scalar_prefetch = 0 : i64, scratch_operands = 0 : i64, tpu.core_type = #tpu.core_type<tc>, window_params = [{transform_indices = @transform_0, window_bounds = array<i64: 16, 128>}, {pipeline_mode = #tpu.pipeline_mode<synchronous>, transform_indices = @transform_1, window_bounds = array<i64: 128, 128>}, {pipeline_mode = #tpu.pipeline_mode<synchronous>, transform_indices = @transform_2, window_bounds = array<i64: 128, 128>}, {pipeline_mode = #tpu.pipeline_mode<synchronous>, transform_indices = @transform_3, window_bounds = array<i64: 128, 128>}, {pipeline_mode = #tpu.pipeline_mode<synchronous>, transform_indices = @transform_4, window_bounds = array<i64: 128, 128>}, {pipeline_mode = #tpu.pipeline_mode<synchronous>, transform_indices = @transform_5, window_bounds = array<i64: 128, 128>}, {pipeline_mode = #tpu.pipeline_mode<synchronous>, transform_indices = @transform_6, window_bounds = array<i64: 128, 128>}, {pipeline_mode = #tpu.pipeline_mode<synchronous>, transform_indices = @transform_7, window_bounds = array<i64: 128, 128>}, {pipeline_mode = #tpu.pipeline_mode<synchronous>, transform_indices = @transform_8, window_bounds = array<i64: 8, 128>}, {transform_indices = @transform_9, window_bounds = array<i64: 16, 128>}]} {
    %c0 = arith.constant 0 : index
    %c0_0 = arith.constant 0 : index
    %0 = vector.load %arg9[%c0, %c0_0] : memref<8x128xf32, #tpu.memory_space<vmem>>, vector<8x128xf32>
    %1 = vector.extract_strided_slice %0 {offsets = [0, 0], sizes = [1, 128], strides = [1, 1]} : vector<8x128xf32> to vector<1x128xf32>
    %2 = vector.extract_strided_slice %0 {offsets = [1, 0], sizes = [1, 128], strides = [1, 1]} : vector<8x128xf32> to vector<1x128xf32>
    %3 = vector.extract_strided_slice %0 {offsets = [2, 0], sizes = [1, 128], strides = [1, 1]} : vector<8x128xf32> to vector<1x128xf32>
    %4 = vector.extract_strided_slice %0 {offsets = [3, 0], sizes = [1, 128], strides = [1, 1]} : vector<8x128xf32> to vector<1x128xf32>
    %5 = vector.extract_strided_slice %0 {offsets = [4, 0], sizes = [1, 128], strides = [1, 1]} : vector<8x128xf32> to vector<1x128xf32>
    %6 = vector.extract_strided_slice %0 {offsets = [5, 0], sizes = [1, 128], strides = [1, 1]} : vector<8x128xf32> to vector<1x128xf32>
    %c0_1 = arith.constant 0 : index
    %c0_2 = arith.constant 0 : index
    %7 = vector.load %arg1[%c0_1, %c0_2] : memref<16x128xbf16, #tpu.memory_space<vmem>>, vector<16x128xbf16>
    %c0_3 = arith.constant 0 : index
    %c0_4 = arith.constant 0 : index
    %8 = vector.load %arg2[%c0_3, %c0_4] : memref<128x128xbf16, #tpu.memory_space<vmem>>, vector<128x128xbf16>
    %cst = arith.constant dense<0.000000e+00> : vector<16x128xf32>
    %9 = tpu.matmul %7, %8, %cst {dimension_numbers = #tpu.dot_dimension_numbers<[1], [0], [0], [1], [0, 0, 1, 1], [], []>} : vector<16x128xbf16>, vector<128x128xbf16>, vector<16x128xf32> -> vector<16x128xf32>
    %10 = vector.broadcast %1 : vector<1x128xf32> to vector<16x128xf32>
    %11 = arith.addf %9, %10 : vector<16x128xf32>
    %cst_5 = arith.constant 2.000000e+01 : f32
    %12 = vector.broadcast %cst_5 : f32 to vector<16x128xf32>
    %13 = arith.minimumf %11, %12 : vector<16x128xf32>
    %14 = math.exp %13 : vector<16x128xf32>
    %cst_6 = arith.constant 2.000000e+00 : f32
    %15 = vector.broadcast %cst_6 : f32 to vector<16x128xf32>
    %16 = arith.addf %14, %15 : vector<16x128xf32>
    %17 = arith.mulf %14, %16 : vector<16x128xf32>
    %18 = arith.mulf %11, %17 : vector<16x128xf32>
    %cst_7 = arith.constant 2.000000e+00 : f32
    %19 = vector.broadcast %cst_7 : f32 to vector<16x128xf32>
    %20 = arith.addf %17, %19 : vector<16x128xf32>
    %21 = tpu.reciprocal %20 {approx = true} : vector<16x128xf32> -> vector<16x128xf32>
    %22 = arith.mulf %18, %21 : vector<16x128xf32>
    %c0_8 = arith.constant 0 : index
    %c0_9 = arith.constant 0 : index
    %23 = vector.load %arg3[%c0_8, %c0_9] : memref<128x128xbf16, #tpu.memory_space<vmem>>, vector<128x128xbf16>
    %24 = arith.truncf %22 : vector<16x128xf32> to vector<16x128xbf16>
    %cst_10 = arith.constant dense<0.000000e+00> : vector<16x128xf32>
    %25 = tpu.matmul %24, %23, %cst_10 {dimension_numbers = #tpu.dot_dimension_numbers<[1], [0], [0], [1], [0, 0, 1, 1], [], []>} : vector<16x128xbf16>, vector<128x128xbf16>, vector<16x128xf32> -> vector<16x128xf32>
    %26 = vector.broadcast %2 : vector<1x128xf32> to vector<16x128xf32>
    %27 = arith.addf %25, %26 : vector<16x128xf32>
    %c0_11 = arith.constant 0 : index
    %c0_12 = arith.constant 0 : index
    %28 = vector.load %arg4[%c0_11, %c0_12] : memref<128x128xbf16, #tpu.memory_space<vmem>>, vector<128x128xbf16>
    %cst_13 = arith.constant dense<0.000000e+00> : vector<16x128xf32>
    %29 = tpu.matmul %7, %28, %cst_13 {dimension_numbers = #tpu.dot_dimension_numbers<[1], [0], [0], [1], [0, 0, 1, 1], [], []>} : vector<16x128xbf16>, vector<128x128xbf16>, vector<16x128xf32> -> vector<16x128xf32>
    %c0_14 = arith.constant 0 : index
    %c0_15 = arith.constant 0 : index
    %30 = vector.load %arg5[%c0_14, %c0_15] : memref<128x128xbf16, #tpu.memory_space<vmem>>, vector<128x128xbf16>
    %31 = arith.truncf %27 : vector<16x128xf32> to vector<16x128xbf16>
    %cst_16 = arith.constant dense<0.000000e+00> : vector<16x128xf32>
    %32 = tpu.matmul %31, %30, %cst_16 {dimension_numbers = #tpu.dot_dimension_numbers<[1], [0], [0], [1], [0, 0, 1, 1], [], []>} : vector<16x128xbf16>, vector<128x128xbf16>, vector<16x128xf32> -> vector<16x128xf32>
    %33 = arith.addf %29, %32 : vector<16x128xf32>
    %34 = vector.broadcast %3 : vector<1x128xf32> to vector<16x128xf32>
    %35 = arith.addf %33, %34 : vector<16x128xf32>
    %cst_17 = arith.constant 2.000000e+01 : f32
    %36 = vector.broadcast %cst_17 : f32 to vector<16x128xf32>
    %37 = arith.minimumf %35, %36 : vector<16x128xf32>
    %38 = math.exp %37 : vector<16x128xf32>
    %cst_18 = arith.constant 2.000000e+00 : f32
    %39 = vector.broadcast %cst_18 : f32 to vector<16x128xf32>
    %40 = arith.addf %38, %39 : vector<16x128xf32>
    %41 = arith.mulf %38, %40 : vector<16x128xf32>
    %42 = arith.mulf %35, %41 : vector<16x128xf32>
    %cst_19 = arith.constant 2.000000e+00 : f32
    %43 = vector.broadcast %cst_19 : f32 to vector<16x128xf32>
    %44 = arith.addf %41, %43 : vector<16x128xf32>
    %45 = tpu.reciprocal %44 {approx = true} : vector<16x128xf32> -> vector<16x128xf32>
    %46 = arith.mulf %42, %45 : vector<16x128xf32>
    %c0_20 = arith.constant 0 : index
    %c0_21 = arith.constant 0 : index
    %47 = vector.load %arg6[%c0_20, %c0_21] : memref<128x128xbf16, #tpu.memory_space<vmem>>, vector<128x128xbf16>
    %48 = arith.truncf %46 : vector<16x128xf32> to vector<16x128xbf16>
    %cst_22 = arith.constant dense<0.000000e+00> : vector<16x128xf32>
    %49 = tpu.matmul %48, %47, %cst_22 {dimension_numbers = #tpu.dot_dimension_numbers<[1], [0], [0], [1], [0, 0, 1, 1], [], []>} : vector<16x128xbf16>, vector<128x128xbf16>, vector<16x128xf32> -> vector<16x128xf32>
    %50 = vector.broadcast %4 : vector<1x128xf32> to vector<16x128xf32>
    %51 = arith.addf %49, %50 : vector<16x128xf32>
    %cst_23 = arith.constant 2.000000e+01 : f32
    %52 = vector.broadcast %cst_23 : f32 to vector<16x128xf32>
    %53 = arith.minimumf %51, %52 : vector<16x128xf32>
    %54 = math.exp %53 : vector<16x128xf32>
    %cst_24 = arith.constant 2.000000e+00 : f32
    %55 = vector.broadcast %cst_24 : f32 to vector<16x128xf32>
    %56 = arith.addf %54, %55 : vector<16x128xf32>
    %57 = arith.mulf %54, %56 : vector<16x128xf32>
    %58 = arith.mulf %51, %57 : vector<16x128xf32>
    %cst_25 = arith.constant 2.000000e+00 : f32
    %59 = vector.broadcast %cst_25 : f32 to vector<16x128xf32>
    %60 = arith.addf %57, %59 : vector<16x128xf32>
    %61 = tpu.reciprocal %60 {approx = true} : vector<16x128xf32> -> vector<16x128xf32>
    %62 = arith.mulf %58, %61 : vector<16x128xf32>
    %c0_26 = arith.constant 0 : index
    %c0_27 = arith.constant 0 : index
    %63 = vector.load %arg7[%c0_26, %c0_27] : memref<128x128xbf16, #tpu.memory_space<vmem>>, vector<128x128xbf16>
    %64 = arith.truncf %62 : vector<16x128xf32> to vector<16x128xbf16>
    %cst_28 = arith.constant dense<0.000000e+00> : vector<16x128xf32>
    %65 = tpu.matmul %64, %63, %cst_28 {dimension_numbers = #tpu.dot_dimension_numbers<[1], [0], [0], [1], [0, 0, 1, 1], [], []>} : vector<16x128xbf16>, vector<128x128xbf16>, vector<16x128xf32> -> vector<16x128xf32>
    %66 = vector.broadcast %5 : vector<1x128xf32> to vector<16x128xf32>
    %67 = arith.addf %65, %66 : vector<16x128xf32>
    %cst_29 = arith.constant 2.000000e+01 : f32
    %68 = vector.broadcast %cst_29 : f32 to vector<16x128xf32>
    %69 = arith.minimumf %67, %68 : vector<16x128xf32>
    %70 = math.exp %69 : vector<16x128xf32>
    %cst_30 = arith.constant 2.000000e+00 : f32
    %71 = vector.broadcast %cst_30 : f32 to vector<16x128xf32>
    %72 = arith.addf %70, %71 : vector<16x128xf32>
    %73 = arith.mulf %70, %72 : vector<16x128xf32>
    %74 = arith.mulf %67, %73 : vector<16x128xf32>
    %cst_31 = arith.constant 2.000000e+00 : f32
    %75 = vector.broadcast %cst_31 : f32 to vector<16x128xf32>
    %76 = arith.addf %73, %75 : vector<16x128xf32>
    %77 = tpu.reciprocal %76 {approx = true} : vector<16x128xf32> -> vector<16x128xf32>
    %78 = arith.mulf %74, %77 : vector<16x128xf32>
    %c0_32 = arith.constant 0 : index
    %c0_33 = arith.constant 0 : index
    %79 = vector.load %arg8[%c0_32, %c0_33] : memref<128x128xbf16, #tpu.memory_space<vmem>>, vector<128x128xbf16>
    %80 = arith.truncf %78 : vector<16x128xf32> to vector<16x128xbf16>
    %cst_34 = arith.constant dense<0.000000e+00> : vector<16x128xf32>
    %81 = tpu.matmul %80, %79, %cst_34 {dimension_numbers = #tpu.dot_dimension_numbers<[1], [0], [0], [1], [0, 0, 1, 1], [], []>} : vector<16x128xbf16>, vector<128x128xbf16>, vector<16x128xf32> -> vector<16x128xf32>
    %82 = vector.broadcast %6 : vector<1x128xf32> to vector<16x128xf32>
    %83 = arith.addf %81, %82 : vector<16x128xf32>
    %84 = arith.truncf %83 : vector<16x128xf32> to vector<16x128xbf16>
    %c0_35 = arith.constant 0 : index
    %c0_36 = arith.constant 0 : index
    %85 = vector.load %arg10[%c0_35, %c0_36] : memref<16x128xbf16, #tpu.memory_space<vmem>>, vector<16x128xbf16>
    tpu.vector_store %arg10[%c0_35, %c0_36], %84 {strides = array<i32>} : memref<16x128xbf16, #tpu.memory_space<vmem>>, vector<16x128xbf16>,
    return
  }
  func.func @transform_0(%arg0: i32) -> (i32, i32) {
    %c0_i32 = arith.constant 0 : i32
    %c0_i32_0 = arith.constant 0 : i32
    return %arg0, %c0_i32 : i32, i32
  }
  func.func @transform_1(%arg0: i32) -> (i32, i32) {
    %c0_i32 = arith.constant 0 : i32
    %c0_i32_0 = arith.constant 0 : i32
    %c0_i32_1 = arith.constant 0 : i32
    return %c0_i32, %c0_i32_0 : i32, i32
  }
  func.func @transform_2(%arg0: i32) -> (i32, i32) {
    %c0_i32 = arith.constant 0 : i32
    %c0_i32_0 = arith.constant 0 : i32
    %c0_i32_1 = arith.constant 0 : i32
    return %c0_i32, %c0_i32_0 : i32, i32
  }
  func.func @transform_3(%arg0: i32) -> (i32, i32) {
    %c0_i32 = arith.constant 0 : i32
    %c0_i32_0 = arith.constant 0 : i32
    %c0_i32_1 = arith.constant 0 : i32
    return %c0_i32, %c0_i32_0 : i32, i32
  }
  func.func @transform_4(%arg0: i32) -> (i32, i32) {
    %c0_i32 = arith.constant 0 : i32
    %c0_i32_0 = arith.constant 0 : i32
    %c0_i32_1 = arith.constant 0 : i32
    return %c0_i32, %c0_i32_0 : i32, i32
  }
  func.func @transform_5(%arg0: i32) -> (i32, i32) {
    %c0_i32 = arith.constant 0 : i32
    %c0_i32_0 = arith.constant 0 : i32
    %c0_i32_1 = arith.constant 0 : i32
    return %c0_i32, %c0_i32_0 : i32, i32
  }
  func.func @transform_6(%arg0: i32) -> (i32, i32) {
    %c0_i32 = arith.constant 0 : i32
    %c0_i32_0 = arith.constant 0 : i32
    %c0_i32_1 = arith.constant 0 : i32
    return %c0_i32, %c0_i32_0 : i32, i32
  }
  func.func @transform_7(%arg0: i32) -> (i32, i32) {
    %c0_i32 = arith.constant 0 : i32
    %c0_i32_0 = arith.constant 0 : i32
    %c0_i32_1 = arith.constant 0 : i32
    return %c0_i32, %c0_i32_0 : i32, i32
  }
  func.func @transform_8(%arg0: i32) -> (i32, i32) {
    %c0_i32 = arith.constant 0 : i32
    %c0_i32_0 = arith.constant 0 : i32
    %c0_i32_1 = arith.constant 0 : i32
    return %c0_i32, %c0_i32_0 : i32, i32
  }
  func.func @transform_9(%arg0: i32) -> (i32, i32) {
    %c0_i32 = arith.constant 0 : i32
    %c0_i32_0 = arith.constant 0 : i32
    return %arg0, %c0_i32 : i32, i32
  }
}

</mosaic_0001>

<bundles_post_ra>
// kernel: tpu_custom_call.1
= control target key start
LH: loop header
LB: loop body
LE: loop exit
PB: predicated region body
PF: predicated region fallthrough
CT: control target
= control target key end

     0   :  { %14 = vsyncpa [#allocation3], 0  ;;  %s1921_s0 = inlined_call_operand.hbm [shape: bf16[16,128], index: 0, kind: input, shape index: {}]   ;;  %s1922_s1 = inlined_call_operand.hbm [shape: bf16[128,128], index: 1, kind: input, shape index: {}]   ;;  %s1923_s2 = inlined_call_operand.hbm [shape: bf16[128,128], index: 2, kind: input, shape index: {}]   ;;  %s1924_s3 = inlined_call_operand.hbm [shape: bf16[128,128], index: 3, kind: input, shape index: {}]   ;;  %s1925_s4 = inlined_call_operand.hbm [shape: bf16[128,128], index: 4, kind: input, shape index: {}]   ;;  %s1926_s5 = inlined_call_operand.hbm [shape: bf16[128,128], index: 5, kind: input, shape index: {}]   ;;  %s1927_s6 = inlined_call_operand.hbm [shape: bf16[128,128], index: 6, kind: input, shape index: {}]   ;;  %s1928_s7 = inlined_call_operand.hbm [shape: bf16[128,128], index: 7, kind: input, shape index: {}]   ;;  %s1929_s8 = inlined_call_operand.vmem [shape: f32[8,128], index: 8, kind: input, shape index: {}]   ;;  %s1930_s9 = inlined_call_operand.hbm [shape: bf16[16,128], index: 9, kind: output, shape index: {}]  }
   0x1   :  { %15 = vsyncpa [#allocation6], 0 }
   0x2   :  { %16 = vsyncpa [#allocation9], 0 }
   0x3   :  { %17 = vsyncpa [#allocation12], 0 }
   0x4   :  { %18 = vsyncpa [#allocation15], 0 }
   0x5   :  { %19 = vsyncpa [#allocation4], 0  ;;  %s1602_s30 = smov [#allocation5]   ;;  %s1603_s11 = smov [#allocation8]  }
   0x6   :  { %s37_s10 = sshll.u32 %s1602_s30, 4  ;;  %s61_s12 = sshll.u32 %s1603_s11, 4  ;;  %s38_s10 = int_to_ptr.vmem [resolvable:$true] %s37_s10  ;;  %s1665_s12 = int_to_ptr.vmem [resolvable:$true] %s61_s12 }
   0x7   :  { %s1392_s15 = scalar_lea.hbm %s1922_s1, 1024 }
   0x8   :  { %p1393_p0 = scmp.ne.s32.totalorder %s1922_s1, %s1392_s15  ;;  %p1396_p1 = scmp.lt.u32.totalorder %s1392_s15, %s1922_s1 }
   0xa   :  { %p1398_p2 = pnand %p1396_p1, %p1393_p0 }
   0xc   :  { %1401 = shalt.err (!%p1398_p2)
}
   0xd   :  { %s1402_s20 = scalar_lea.vmem %s38_s10, 1024  ;;  %p1407_p4 = scmp.lt.s32.totalorder %s38_s10, %s38_s10 }
   0xe   :  { %p1403_p3 = scmp.ne.s32.totalorder %s38_s10, %s1402_s20  ;;  %p1408_p5 = scmp.lt.s32.totalorder %s1402_s20, %s1402_s20 }
  0x10   :  { %p1409_p6 = por %p1408_p5, %p1407_p4 }
  0x12   :  { %p1410_p7 = pnand %p1409_p6, %p1403_p3 }
  0x14   :  { %1413 = shalt.err (!%p1410_p7)
}
  0x15   :  { %s1604_s21 = smov 64   ;;  %s1605_s22 = smov 4  }
  0x16   :  { %43 = dma.hbm_to_vmem [thread:$0]  %s1922_s1, 1024, %s38_s10, [#allocation6], %s1604_s21, %s1604_s21, %s1605_s22  }
  0x17   :  { %s1414_s27 = scalar_lea.hbm %s1924_s3, 1024 }
  0x18   :  { %p1415_p8 = scmp.ne.s32.totalorder %s1924_s3, %s1414_s27  ;;  %p1418_p9 = scmp.lt.u32.totalorder %s1414_s27, %s1924_s3 }
  0x1a   :  { %p1420_p10 = pnand %p1418_p9, %p1415_p8 }
  0x1c   :  { %1423 = shalt.err (!%p1420_p10)
}
  0x1d   :  { %s1424_s13 = scalar_lea.vmem %s1665_s12, 1024  ;;  %p1429_p12 = scmp.lt.s32.totalorder %s1665_s12, %s1665_s12 }
  0x1e   :  { %p1425_p11 = scmp.ne.s32.totalorder %s1665_s12, %s1424_s13  ;;  %p1430_p13 = scmp.lt.s32.totalorder %s1424_s13, %s1424_s13 }
  0x20   :  { %p1431_p0 = por %p1430_p13, %p1429_p12 }
  0x22   :  { %p1432_p1 = pnand %p1431_p0, %p1425_p11 }
  0x24   :  { %1435 = shalt.err (!%p1432_p1)
}
  0x25   :  { %67 = dma.hbm_to_vmem [thread:$0]  %s1924_s3, 1024, %s1665_s12, [#allocation9], %s1604_s21, %s1604_s21, %s1605_s22  }
  0x26   :  { %s1606_s14 = smov [#allocation11]   ;;  %s1607_s16 = smov [#allocation2]  }
  0x27   :  { %s85_s15 = sshll.u32 %s1606_s14, 4  ;;  %s25_s17 = sshll.u32 %s1607_s16, 4  ;;  %s86_s15 = int_to_ptr.vmem [resolvable:$true] %s85_s15  ;;  %s1702_s17 = int_to_ptr.vmem [resolvable:$true] %s25_s17 }
  0x28   :  { %s1436_s20 = scalar_lea.hbm %s1926_s5, 1024 }
  0x29   :  { %p1437_p2 = scmp.ne.s32.totalorder %s1926_s5, %s1436_s20  ;;  %p1440_p3 = scmp.lt.u32.totalorder %s1436_s20, %s1926_s5 }
  0x2b   :  { %p1442_p4 = pnand %p1440_p3, %p1437_p2 }
  0x2d   :  { %1445 = shalt.err (!%p1442_p4)
}
  0x2e   :  { %s1446_s3 = scalar_lea.vmem %s86_s15, 1024  ;;  %p1451_p6 = scmp.lt.s32.totalorder %s86_s15, %s86_s15 }
  0x2f   :  { %p1447_p5 = scmp.ne.s32.totalorder %s86_s15, %s1446_s3  ;;  %p1452_p7 = scmp.lt.s32.totalorder %s1446_s3, %s1446_s3 }
  0x31   :  { %p1453_p8 = por %p1452_p7, %p1451_p6 }
  0x33   :  { %p1454_p9 = pnand %p1453_p8, %p1447_p5 }
  0x35   :  { %1457 = shalt.err (!%p1454_p9)
}
  0x36   :  { %91 = dma.hbm_to_vmem [thread:$0]  %s1926_s5, 1024, %s86_s15, [#allocation12], %s1604_s21, %s1604_s21, %s1605_s22  }
  0x37   :  { %s1458_s30 = scalar_lea.hbm %s1921_s0, 128 }
  0x38   :  { %p1459_p10 = scmp.ne.s32.totalorder %s1921_s0, %s1458_s30  ;;  %p1462_p11 = scmp.lt.u32.totalorder %s1458_s30, %s1921_s0 }
  0x3a   :  { %p1464_p12 = pnand %p1462_p11, %p1459_p10 }
  0x3c   :  { %1467 = shalt.err (!%p1464_p12)
}
  0x3d   :  { %s1468_s14 = scalar_lea.vmem %s1702_s17, 128  ;;  %p1473_p0 = scmp.lt.s32.totalorder %s1702_s17, %s1702_s17 }
  0x3e   :  { %p1469_p13 = scmp.ne.s32.totalorder %s1702_s17, %s1468_s14  ;;  %p1474_p1 = scmp.lt.s32.totalorder %s1468_s14, %s1468_s14 }
  0x40   :  { %p1475_p2 = por %p1474_p1, %p1473_p0 }
  0x42   :  { %p1476_p3 = pnand %p1475_p2, %p1469_p13 }
  0x44   :  { %1479 = shalt.err (!%p1476_p3)
}
  0x45   :  { %31 = dma.hbm_to_vmem [thread:$0]  %s1921_s0, 128, %s1702_s17, [#allocation3], %s1604_s21, %s1604_s21, %s1605_s22  }
  0x46   :  { %s1608_s16 = smov [#allocation7]   ;;  %s1609_s19 = smov [#allocation10]  }
  0x47   :  { %s49_s18 = sshll.u32 %s1608_s16, 4  ;;  %s73_s20 = sshll.u32 %s1609_s19, 4  ;;  %s50_s18 = int_to_ptr.vmem [resolvable:$true] %s49_s18  ;;  %s1739_s20 = int_to_ptr.vmem [resolvable:$true] %s73_s20 }
  0x48   :  { %s1480_s25 = scalar_lea.hbm %s1923_s2, 1024 }
  0x49   :  { %p1481_p4 = scmp.ne.s32.totalorder %s1923_s2, %s1480_s25  ;;  %p1484_p5 = scmp.lt.u32.totalorder %s1480_s25, %s1923_s2 }
  0x4b   :  { %p1486_p6 = pnand %p1484_p5, %p1481_p4 }
  0x4d   :  { %1489 = shalt.err (!%p1486_p6)
}
  0x4e   :  { %s1490_s0 = scalar_lea.vmem %s50_s18, 1024  ;;  %p1495_p8 = scmp.lt.s32.totalorder %s50_s18, %s50_s18 }
  0x4f   :  { %p1491_p7 = scmp.ne.s32.totalorder %s50_s18, %s1490_s0  ;;  %p1496_p9 = scmp.lt.s32.totalorder %s1490_s0, %s1490_s0 }
  0x51   :  { %p1497_p10 = por %p1496_p9, %p1495_p8 }
  0x53   :  { %p1498_p11 = pnand %p1497_p10, %p1491_p7 }
  0x55   :  { %1501 = shalt.err (!%p1498_p11)
}
  0x56   :  { %55 = dma.hbm_to_vmem [thread:$0]  %s1923_s2, 1024, %s50_s18, [#allocation6], %s1604_s21, %s1604_s21, %s1605_s22  }
  0x57   :  { %s1502_s11 = scalar_lea.hbm %s1925_s4, 1024 }
  0x58   :  { %p1503_p12 = scmp.ne.s32.totalorder %s1925_s4, %s1502_s11  ;;  %p1506_p13 = scmp.lt.u32.totalorder %s1502_s11, %s1925_s4 }
  0x5a   :  { %p1508_p0 = pnand %p1506_p13, %p1503_p12 }
  0x5c   :  { %1511 = shalt.err (!%p1508_p0)
}
  0x5d   :  { %s1512_s5 = scalar_lea.vmem %s1739_s20, 1024  ;;  %p1517_p2 = scmp.lt.s32.totalorder %s1739_s20, %s1739_s20 }
  0x5e   :  { %p1513_p1 = scmp.ne.s32.totalorder %s1739_s20, %s1512_s5  ;;  %p1518_p3 = scmp.lt.s32.totalorder %s1512_s5, %s1512_s5 }
  0x60   :  { %p1519_p4 = por %p1518_p3, %p1517_p2 }
  0x62   :  { %p1520_p5 = pnand %p1519_p4, %p1513_p1 }
  0x64   :  { %1523 = shalt.err (!%p1520_p5)
}
  0x65   :  { %79 = dma.hbm_to_vmem [thread:$0]  %s1925_s4, 1024, %s1739_s20, [#allocation9], %s1604_s21, %s1604_s21, %s1605_s22  }
  0x66   :  { %s1610_s16 = smov [#allocation13]   ;;  %s1611_s19 = smov [#allocation14]  }
  0x67   :  { %s97_s18 = sshll.u32 %s1610_s16, 4  ;;  %s109_s23 = sshll.u32 %s1611_s19, 4  ;;  %s98_s18 = int_to_ptr.vmem [resolvable:$true] %s97_s18  ;;  %s1776_s23 = int_to_ptr.vmem [resolvable:$true] %s109_s23 }
  0x68   :  { %s1524_s26 = scalar_lea.hbm %s1927_s6, 1024 }
  0x69   :  { %p1525_p6 = scmp.ne.s32.totalorder %s1927_s6, %s1524_s26  ;;  %p1528_p7 = scmp.lt.u32.totalorder %s1524_s26, %s1927_s6 }
  0x6b   :  { %p1530_p8 = pnand %p1528_p7, %p1525_p6 }
  0x6d   :  { %1533 = shalt.err (!%p1530_p8)
}
  0x6e   :  { %s1534_s4 = scalar_lea.vmem %s98_s18, 1024  ;;  %p1539_p10 = scmp.lt.s32.totalorder %s98_s18, %s98_s18 }
  0x6f   :  { %p1535_p9 = scmp.ne.s32.totalorder %s98_s18, %s1534_s4  ;;  %p1540_p11 = scmp.lt.s32.totalorder %s1534_s4, %s1534_s4 }
  0x71   :  { %p1541_p12 = por %p1540_p11, %p1539_p10 }
  0x73   :  { %p1542_p13 = pnand %p1541_p12, %p1535_p9 }
  0x75   :  { %1545 = shalt.err (!%p1542_p13)
}
  0x76   :  { %103 = dma.hbm_to_vmem [thread:$0]  %s1927_s6, 1024, %s98_s18, [#allocation12], %s1604_s21, %s1604_s21, %s1605_s22  }
  0x77   :  { %s1546_s30 = scalar_lea.hbm %s1928_s7, 1024 }
  0x78   :  { %p1547_p0 = scmp.ne.s32.totalorder %s1928_s7, %s1546_s30  ;;  %p1550_p1 = scmp.lt.u32.totalorder %s1546_s30, %s1928_s7 }
  0x7a   :  { %p1552_p2 = pnand %p1550_p1, %p1547_p0 }
  0x7c   :  { %1555 = shalt.err (!%p1552_p2)
}
  0x7d   :  { %s1556_s14 = scalar_lea.vmem %s1776_s23, 1024  ;;  %p1561_p4 = scmp.lt.s32.totalorder %s1776_s23, %s1776_s23 }
  0x7e   :  { %p1557_p3 = scmp.ne.s32.totalorder %s1776_s23, %s1556_s14  ;;  %p1562_p5 = scmp.lt.s32.totalorder %s1556_s14, %s1556_s14 }
  0x80   :  { %p1563_p6 = por %p1562_p5, %p1561_p4 }
  0x82   :  { %p1564_p7 = pnand %p1563_p6, %p1557_p3 }
  0x84   :  { %1567 = shalt.err (!%p1564_p7)
}
  0x85   :  { %115 = dma.hbm_to_vmem [thread:$0]  %s1928_s7, 1024, %s1776_s23, [#allocation15], %s1604_s21, %s1604_s21, %s1605_s22  }
  0x86   :  { %1590 = dma.done.wait [#allocation3], 128  }
  0x87   :  { %1591 = vsyncadd [#allocation3], 4294967168 }
  0x88   :  { %1592 = dma.done.wait [#allocation6], 2048  }
  0x89   :  { %1593 = vsyncadd [#allocation6], 4294965248 }
  0x8a   :  { %1594 = dma.done.wait [#allocation9], 2048  }
  0x8b   :  { %1595 = vsyncadd [#allocation9], 4294965248 }
  0x8c   :  { %1596 = dma.done.wait [#allocation12], 2048  }
  0x8d   :  { %1597 = vsyncadd [#allocation12], 4294965248 }
  0x8e   :  { %1598 = dma.done.wait [#allocation15], 1024  }
  0x8f   :  { %1599 = vsyncadd [#allocation15], 4294966272  ;;  %v1612_v0 = vmov 0.0   ;;  %vm1613_vm0 = vmmov 0   ;;  %v1303_v1 = vld [vmem:[#allocation5] sm:$0xff]   ;;  %v1304_v2 = vld [vmem:[#allocation5 + $0x8] sm:$0xff]   ;;  %v162_v24 = vlaneseq }
  0x90   :  { %1150 = vmatprep.subr.bf16.mxu0 %v1612_v0  ;;  %1166 = vmatprep.mubr.msk.bf16.mxu0 %vm1613_vm0, %v1612_v0  ;;  %v1305_v3 = vld [vmem:[#allocation5 + $0x10] sm:$0xff]   ;;  %v1306_v4 = vld [vmem:[#allocation5 + $0x18] sm:$0xff]   ;;  %v1307_v5 = vld [vmem:[#allocation5 + $0x20] sm:$0xff]  }
  0x91   :  { %1170 = vmatprep.subr.bf16.mxu1 %v1612_v0  ;;  %1186 = vmatprep.mubr.msk.bf16.mxu1 %vm1613_vm0, %v1612_v0  ;;  %v1308_v6 = vld [vmem:[#allocation5 + $0x28] sm:$0xff]   ;;  %v1309_v7 = vld [vmem:[#allocation5 + $0x30] sm:$0xff]   ;;  %v1310_v8 = vld [vmem:[#allocation5 + $0x38] sm:$0xff]   ;;  %v1846_v25 = vshrl.u32 %v162_v24, 7 }
  0x92   :  { %1151 = vmatpush3.bf16.msra.mxu0 %v1303_v1  ;;  %v1826_v9 = vld [vmem:[#allocation2] sm:$0xff]   ;;  %v1312_v10 = vld [vmem:[#allocation7] sm:$0xff]   ;;  %v1313_v11 = vld [vmem:[#allocation7 + $0x8] sm:$0xff]  }
  0x93   :  { %1152 = vmatprep.subr.bf16.mxu0 %v1612_v0  ;;  %1171 = vmatpush3.bf16.msra.mxu1 %v1312_v10  ;;  %v1314_v12 = vld [vmem:[#allocation7 + $0x10] sm:$0xff]   ;;  %v1315_v13 = vld [vmem:[#allocation7 + $0x18] sm:$0xff]   ;;  %v1316_v14 = vld [vmem:[#allocation7 + $0x20] sm:$0xff]   ;;  %v164_v26 = vsub.s32 0, %v1846_v25  ;;  %v298_v1 = vsub.s32 1, %v1846_v25 }
  0x94   :  { %1172 = vmatprep.subr.bf16.mxu1 %v1612_v0  ;;  %v1317_v15 = vld [vmem:[#allocation7 + $0x28] sm:$0xff]   ;;  %v1318_v16 = vld [vmem:[#allocation7 + $0x30] sm:$0xff]   ;;  %v1319_v17 = vld [vmem:[#allocation7 + $0x38] sm:$0xff]  }
  0x95   :  { %v1321_v18 = vld [vmem:[#allocation10] sm:$0xff]   ;;  %v1323_v19 = vld [vmem:[#allocation10 + $0x8] sm:$0xff]   ;;  %v1325_v20 = vld [vmem:[#allocation10 + $0x10] sm:$0xff]  }
  0x96   :  { %1153 = vmatpush3.bf16.msra.mxu0 %v1304_v2  ;;  %v1327_v21 = vld [vmem:[#allocation10 + $0x18] sm:$0xff]   ;;  %v1329_v22 = vld [vmem:[#allocation10 + $0x20] sm:$0xff]   ;;  %v1331_v23 = vld [vmem:[#allocation10 + $0x28] sm:$0xff]  }
  0x97   :  { %1154 = vmatprep.subr.bf16.mxu0 %v1612_v0  ;;  %1173 = vmatpush3.bf16.msra.mxu1 %v1313_v11  ;;  %v1852_v27 = vld [vmem:[%s1929_s8] sm:$0xff]  ;;  %v1320_v53 = vld [vmem:[#allocation8] sm:$0xff]   ;;  %v1322_v55 = vld [vmem:[#allocation8 + $0x8] sm:$0xff]   ;;  %s1614_s8 = smov [#allocation16]  }
  0x98   :  { %1174 = vmatprep.subr.bf16.mxu1 %v1612_v0  ;;  %v165_v28 = vrot.slane %v1852_v27, %v164_v26  ;;  %v1324_v56 = vld [vmem:[#allocation8 + $0x10] sm:$0xff]   ;;  %v1326_v57 = vld [vmem:[#allocation8 + $0x18] sm:$0xff]   ;;  %v1328_v58 = vld [vmem:[#allocation8 + $0x20] sm:$0xff]   ;;  %v299_v2 = vrot.slane %v1852_v27, %v298_v1  ;;  %s1005_s15 = sshll.u32 %s1614_s8, 4  ;;  %s1006_s15 = int_to_ptr.vmem [resolvable:$true] %s1005_s15 }
  0x99   :  { %v1330_v59 = vld [vmem:[#allocation8 + $0x28] sm:$0xff]   ;;  %v1332_v60 = vld [vmem:[#allocation8 + $0x30] sm:$0xff]   ;;  %v1334_v62 = vld [vmem:[#allocation8 + $0x38] sm:$0xff]   ;;  %s1568_s16 = scalar_lea.vmem %s1006_s15, 128  ;;  %p1573_p9 = scmp.lt.s32.totalorder %s1006_s15, %s1006_s15 }
  0x9a   :  { %1155 = vmatpush3.bf16.msra.mxu0 %v1305_v3  ;;  %v1333_v61 = vld [vmem:[#allocation10 + $0x30] sm:$0xff]   ;;  %v1335_v63 = vld [vmem:[#allocation10 + $0x38] sm:$0xff]   ;;  %p1569_p8 = scmp.ne.s32.totalorder %s1006_s15, %s1568_s16  ;;  %p1574_p10 = scmp.lt.s32.totalorder %s1568_s16, %s1568_s16 }
  0x9b   :  { %1156 = vmatprep.subr.bf16.mxu0 %v1612_v0  ;;  %1175 = vmatpush3.bf16.msra.mxu1 %v1314_v12 }
  0x9c   :  { %1176 = vmatprep.subr.bf16.mxu1 %v1612_v0  ;;  %p1575_p11 = por %p1574_p10, %p1573_p9 }
  0x9e   :  { %1157 = vmatpush3.bf16.msra.mxu0 %v1306_v4  ;;  %p1576_p12 = pnand %p1575_p11, %p1569_p8 }
  0x9f   :  { %1158 = vmatprep.subr.bf16.mxu0 %v1612_v0  ;;  %1177 = vmatpush3.bf16.msra.mxu1 %v1315_v13 }
  0xa0   :  { %1178 = vmatprep.subr.bf16.mxu1 %v1612_v0 }
  0xa2   :  { %1159 = vmatpush3.bf16.msra.mxu0 %v1307_v5 }
  0xa3   :  { %1160 = vmatprep.subr.bf16.mxu0 %v1612_v0  ;;  %1179 = vmatpush3.bf16.msra.mxu1 %v1316_v14  ;;  %v1336_v14 = vld [vmem:[#allocation11] sm:$0xff]  }
  0xa4   :  { %1180 = vmatprep.subr.bf16.mxu1 %v1612_v0 }
  0xa6   :  { %1161 = vmatpush3.bf16.msra.mxu0 %v1308_v6 }
  0xa7   :  { %1162 = vmatprep.subr.bf16.mxu0 %v1612_v0  ;;  %1181 = vmatpush3.bf16.msra.mxu1 %v1317_v15  ;;  %v1337_v15 = vld [vmem:[#allocation11 + $0x8] sm:$0xff]  }
  0xa8   :  { %1182 = vmatprep.subr.bf16.mxu1 %v1612_v0 }
  0xaa   :  { %1163 = vmatpush3.bf16.msra.mxu0 %v1309_v7 }
  0xab   :  { %1164 = vmatprep.subr.bf16.mxu0 %v1612_v0  ;;  %1183 = vmatpush3.bf16.msra.mxu1 %v1318_v16  ;;  %v1338_v16 = vld [vmem:[#allocation11 + $0x10] sm:$0xff]  }
  0xac   :  { %1184 = vmatprep.subr.bf16.mxu1 %v1612_v0 }
  0xae   :  { %1165 = vmatpush3.bf16.msra.mxu0 %v1310_v8 }
  0xaf   :  { %1190 = vmatprep.subr.bf16.mxu0 %v1612_v0  ;;  %1185 = vmatpush3.bf16.msra.mxu1 %v1319_v17  ;;  %v1339_v17 = vld [vmem:[#allocation11 + $0x18] sm:$0xff]  }
  0xb0   :  { %1210 = vmatprep.subr.bf16.mxu1 %v1612_v0 }
  0xb1   :  { %1167 = vmatmul.mubr.bf16.vlgmr.msra.gmra.mrb[0].mxu0 %v1826_v9 }
  0xb2   :  { %1206 = vmatprep.mubr.msk.bf16.mxu0 %vm1613_vm0, %v1612_v0  ;;  %1191 = vmatpush3.bf16.msra.mxu0 %v1321_v18  ;;  %v1340_v18 = vld [vmem:[#allocation11 + $0x20] sm:$0xff]  }
  0xb3   :  { %1192 = vmatprep.subr.bf16.mxu0 %v1612_v0 }
  0xb6   :  { %1193 = vmatpush3.bf16.msra.mxu0 %v1323_v19  ;;  %v1341_v19 = vld [vmem:[#allocation11 + $0x28] sm:$0xff]  }
  0xb7   :  { %1194 = vmatprep.subr.bf16.mxu0 %v1612_v0 }
  0xba   :  { %1195 = vmatpush3.bf16.msra.mxu0 %v1325_v20  ;;  %v1342_v20 = vld [vmem:[#allocation11 + $0x30] sm:$0xff]  }
  0xbb   :  { %1196 = vmatprep.subr.bf16.mxu0 %v1612_v0 }
  0xbe   :  { %1197 = vmatpush3.bf16.msra.mxu0 %v1327_v21  ;;  %v1343_v21 = vld [vmem:[#allocation11 + $0x38] sm:$0xff]  }
  0xbf   :  { %1198 = vmatprep.subr.bf16.mxu0 %v1612_v0 }
  0xc2   :  { %1199 = vmatpush3.bf16.msra.mxu0 %v1329_v22  ;;  %v602_v22 = vsub.s32 2, %v1846_v25 }
  0xc3   :  { %1200 = vmatprep.subr.bf16.mxu0 %v1612_v0 }
  0xc6   :  { %1201 = vmatpush3.bf16.msra.mxu0 %v1331_v23  ;;  %v603_v23 = vrot.slane %v1852_v27, %v602_v22 }
  0xc7   :  { %1202 = vmatprep.subr.bf16.mxu0 %v1612_v0 }
  0xca   :  { %1203 = vmatpush3.bf16.msra.mxu0 %v1333_v61  ;;  %v643_v61 = vsub.s32 3, %v1846_v25 }
  0xcb   :  { %1204 = vmatprep.subr.bf16.mxu0 %v1612_v0 }
  0xce   :  { %1205 = vmatpush3.bf16.msra.mxu0 %v1335_v63 }
  0xcf   :  { %1230 = vmatprep.subr.bf16.mxu0 %v1612_v0 }
 0x184   :  { %v254_v29 = vpop.f32.mrb[0].mxu0 }
 0x185   :  { %v255_v30 = vadd.f32 %v254_v29, %v165_v28  ;;  %v1168_v31 = vpop.f32.mrb[1].mxu0 }
 0x186   :  { %v257_v32 = vpop.f32.mrb[2].mxu0 }
 0x187   :  { %v261_v33 = vmin.f32 %v255_v30, 20.0  ;;  %v258_v34 = vadd.f32 %v257_v32, %v165_v28  ;;  %v1169_v35 = vpop.f32.mrb[3].mxu0 }
 0x189   :  { %v263_v36 = vmul.f32 1.442695, %v261_v33  ;;  %v262_v37 = vmin.f32 %v258_v34, 20.0 }
 0x18b   :  { %1360 = vpow2.f32 %v263_v36  ;;  %v265_v38 = vmul.f32 1.442695, %v262_v37 }
 0x18d   :  { %1362 = vpow2.f32 %v265_v38 }
 0x195   :  { %v1361_v39 = vpop.eup %1360 }
 0x196   :  { %v267_v40 = vadd.f32 2.0, %v1361_v39 }
 0x197   :  { %v1363_v41 = vpop.eup %1362 }
 0x198   :  { %v269_v42 = vmul.f32 %v1361_v39, %v267_v40  ;;  %v268_v43 = vadd.f32 2.0, %v1363_v41 }
 0x19a   :  { %v273_v44 = vadd.f32 2.0, %v269_v42  ;;  %v270_v45 = vmul.f32 %v1363_v41, %v268_v43  ;;  %v271_v48 = vmul.f32 %v269_v42, %v255_v30 }
 0x19c   :  { %1364 = vrcp.f32 %v273_v44  ;;  %v274_v46 = vadd.f32 2.0, %v270_v45  ;;  %v272_v49 = vmul.f32 %v270_v45, %v258_v34 }
 0x19e   :  { %1366 = vrcp.f32 %v274_v46 }
 0x1a6   :  { %v1365_v47 = vpop.eup %1364 }
 0x1a7   :  { %v277_v51 = vmul.f32 %v1365_v47, %v271_v48 }
 0x1a8   :  { %v1367_v50 = vpop.eup %1366 }
 0x1a9   :  { %v278_v52 = vmul.f32 %v1367_v50, %v272_v49 }
 0x1ab   :  { %v295_v54 = vpack.c.bf16 %v278_v52, %v277_v51 }
 0x1ad   :  { %1187 = vmatmul.mubr.bf16.vlgmr.msra.gmra.mrb[0].mxu1 %v295_v54  ;;  %v1345_v54 = vld [vmem:[#allocation13 + $0x8] sm:$0xff]  }
 0x1ae   :  { %1211 = vmatpush3.bf16.msra.mxu1 %v1320_v53  ;;  %1226 = vmatprep.mubr.msk.bf16.mxu1 %vm1613_vm0, %v1612_v0  ;;  %v1344_v53 = vld [vmem:[#allocation13] sm:$0xff]  }
 0x1af   :  { %1212 = vmatprep.subr.bf16.mxu1 %v1612_v0 }
 0x1b2   :  { %1213 = vmatpush3.bf16.msra.mxu1 %v1322_v55  ;;  %v1346_v55 = vld [vmem:[#allocation13 + $0x10] sm:$0xff]  }
 0x1b3   :  { %1214 = vmatprep.subr.bf16.mxu1 %v1612_v0 }
 0x1b6   :  { %1215 = vmatpush3.bf16.msra.mxu1 %v1324_v56  ;;  %v1347_v56 = vld [vmem:[#allocation13 + $0x18] sm:$0xff]  }
 0x1b7   :  { %1216 = vmatprep.subr.bf16.mxu1 %v1612_v0 }
 0x1ba   :  { %1217 = vmatpush3.bf16.msra.mxu1 %v1326_v57  ;;  %v1348_v57 = vld [vmem:[#allocation13 + $0x20] sm:$0xff]  }
 0x1bb   :  { %1218 = vmatprep.subr.bf16.mxu1 %v1612_v0 }
 0x1be   :  { %1219 = vmatpush3.bf16.msra.mxu1 %v1328_v58  ;;  %v1349_v58 = vld [vmem:[#allocation13 + $0x28] sm:$0xff]  }
 0x1bf   :  { %1220 = vmatprep.subr.bf16.mxu1 %v1612_v0 }
 0x1c2   :  { %1221 = vmatpush3.bf16.msra.mxu1 %v1330_v59  ;;  %v1350_v59 = vld [vmem:[#allocation13 + $0x30] sm:$0xff]  }
 0x1c3   :  { %1222 = vmatprep.subr.bf16.mxu1 %v1612_v0 }
 0x1c6   :  { %1223 = vmatpush3.bf16.msra.mxu1 %v1332_v60  ;;  %v1351_v60 = vld [vmem:[#allocation13 + $0x38] sm:$0xff]  }
 0x1c7   :  { %1224 = vmatprep.subr.bf16.mxu1 %v1612_v0 }
 0x1ca   :  { %1225 = vmatpush3.bf16.msra.mxu1 %v1334_v62  ;;  %v644_v62 = vrot.slane %v1852_v27, %v643_v61  ;;  %v899_v61 = vsub.s32 5, %v1846_v25 }
 0x1cb   :  { %1250 = vmatprep.subr.bf16.mxu1 %v1612_v0 }
 0x1cd   :  { %1227 = vmatmul.mubr.bf16.vlgmr.msra.gmra.mrb[4].mxu1 %v1826_v9 }
 0x1ce   :  { %1266 = vmatprep.mubr.msk.bf16.mxu1 %vm1613_vm0, %v1612_v0  ;;  %1251 = vmatpush3.bf16.msra.mxu1 %v1344_v53 }
 0x1cf   :  { %1252 = vmatprep.subr.bf16.mxu1 %v1612_v0 }
 0x1d2   :  { %1253 = vmatpush3.bf16.msra.mxu1 %v1345_v54 }
 0x1d3   :  { %1254 = vmatprep.subr.bf16.mxu1 %v1612_v0 }
 0x1d6   :  { %1255 = vmatpush3.bf16.msra.mxu1 %v1346_v55 }
 0x1d7   :  { %1256 = vmatprep.subr.bf16.mxu1 %v1612_v0 }
 0x1da   :  { %1257 = vmatpush3.bf16.msra.mxu1 %v1347_v56 }
 0x1db   :  { %1258 = vmatprep.subr.bf16.mxu1 %v1612_v0 }
 0x1de   :  { %1259 = vmatpush3.bf16.msra.mxu1 %v1348_v57 }
 0x1df   :  { %1260 = vmatprep.subr.bf16.mxu1 %v1612_v0 }
 0x1e2   :  { %1261 = vmatpush3.bf16.msra.mxu1 %v1349_v58 }
 0x1e3   :  { %1262 = vmatprep.subr.bf16.mxu1 %v1612_v0 }
 0x1e6   :  { %1263 = vmatpush3.bf16.msra.mxu1 %v1350_v59 }
 0x1e7   :  { %1264 = vmatprep.subr.bf16.mxu1 %v1612_v0 }
 0x1ea   :  { %1265 = vmatpush3.bf16.msra.mxu1 %v1351_v60 }
 0x280   :  { %v382_v3 = vpop.f32.mrb[0].mxu1 }
 0x281   :  { %v1188_v4 = vpop.f32.mrb[1].mxu1  ;;  %v383_v6 = vadd.f32 %v382_v3, %v299_v2 }
 0x282   :  { %v385_v5 = vpop.f32.mrb[2].mxu1 }
 0x283   :  { %v386_v7 = vadd.f32 %v385_v5, %v299_v2  ;;  %v1189_v8 = vpop.f32.mrb[3].mxu1 }
 0x285   :  { %v421_v10 = vpack.c.bf16 %v386_v7, %v383_v6 }
 0x287   :  { %1207 = vmatmul.mubr.bf16.vlgmr.msra.gmra.mrb[4].mxu0 %v421_v10 }
 0x288   :  { %1246 = vmatprep.mubr.msk.bf16.mxu0 %vm1613_vm0, %v1612_v0  ;;  %1231 = vmatpush3.bf16.msra.mxu0 %v1336_v14 }
 0x289   :  { %1232 = vmatprep.subr.bf16.mxu0 %v1612_v0 }
 0x28c   :  { %1233 = vmatpush3.bf16.msra.mxu0 %v1337_v15 }
 0x28d   :  { %1234 = vmatprep.subr.bf16.mxu0 %v1612_v0 }
 0x290   :  { %1235 = vmatpush3.bf16.msra.mxu0 %v1338_v16 }
 0x291   :  { %1236 = vmatprep.subr.bf16.mxu0 %v1612_v0 }
 0x294   :  { %1237 = vmatpush3.bf16.msra.mxu0 %v1339_v17 }
 0x295   :  { %1238 = vmatprep.subr.bf16.mxu0 %v1612_v0 }
 0x298   :  { %1239 = vmatpush3.bf16.msra.mxu0 %v1340_v18 }
 0x299   :  { %1240 = vmatprep.subr.bf16.mxu0 %v1612_v0 }
 0x29c   :  { %1241 = vmatpush3.bf16.msra.mxu0 %v1341_v19 }
 0x29d   :  { %1242 = vmatprep.subr.bf16.mxu0 %v1612_v0 }
 0x2a0   :  { %v593_v9 = vpop.f32.mrb[4].mxu1  ;;  %1243 = vmatpush3.bf16.msra.mxu0 %v1342_v20 }
 0x2a1   :  { %v1228_v11 = vpop.f32.mrb[5].mxu1  ;;  %1244 = vmatprep.subr.bf16.mxu0 %v1612_v0 }
 0x2a2   :  { %v596_v12 = vpop.f32.mrb[6].mxu1 }
 0x2a3   :  { %v1229_v13 = vpop.f32.mrb[7].mxu1 }
 0x2a4   :  { %1245 = vmatpush3.bf16.msra.mxu0 %v1343_v21 }
 0x2a5   :  { %1270 = vmatprep.subr.bf16.mxu0 %v1612_v0 }
 0x35a   :  { %v504_v24 = vpop.f32.mrb[4].mxu0 }
 0x35b   :  { %v594_v26 = vadd.f32 %v593_v9, %v504_v24  ;;  %v1208_v28 = vpop.f32.mrb[5].mxu0 }
 0x35c   :  { %v507_v29 = vpop.f32.mrb[6].mxu0  ;;  %v1353_v28 = vld [vmem:[#allocation14 + $0x8] sm:$0xff]  }
 0x35d   :  { %v604_v30 = vadd.f32 %v603_v23, %v594_v26  ;;  %v597_v31 = vadd.f32 %v596_v12, %v507_v29  ;;  %v1209_v32 = vpop.f32.mrb[7].mxu0  ;;  %v1352_v26 = vld [vmem:[#allocation14] sm:$0xff]   ;;  %v1354_v29 = vld [vmem:[#allocation14 + $0x10] sm:$0xff]  }
 0x35e   :  { %v1357_v32 = vld [vmem:[#allocation14 + $0x28] sm:$0xff]  }
 0x35f   :  { %v606_v33 = vmin.f32 %v604_v30, 20.0  ;;  %v605_v34 = vadd.f32 %v603_v23, %v597_v31  ;;  %v1356_v31 = vld [vmem:[#allocation14 + $0x20] sm:$0xff]  }
 0x361   :  { %v608_v35 = vmul.f32 1.442695, %v606_v33  ;;  %v607_v36 = vmin.f32 %v605_v34, 20.0  ;;  %v1358_v33 = vld [vmem:[#allocation14 + $0x30] sm:$0xff]  }
 0x363   :  { %1368 = vpow2.f32 %v608_v35  ;;  %v610_v37 = vmul.f32 1.442695, %v607_v36  ;;  %v771_v35 = vsub.s32 4, %v1846_v25 }
 0x365   :  { %1370 = vpow2.f32 %v610_v37  ;;  %v772_v36 = vrot.slane %v1852_v27, %v771_v35 }
 0x36d   :  { %v1369_v38 = vpop.eup %1368 }
 0x36e   :  { %v612_v39 = vadd.f32 2.0, %v1369_v38 }
 0x36f   :  { %v1371_v40 = vpop.eup %1370 }
 0x370   :  { %v614_v41 = vmul.f32 %v1369_v38, %v612_v39  ;;  %v613_v42 = vadd.f32 2.0, %v1371_v40 }
 0x372   :  { %v618_v43 = vadd.f32 2.0, %v614_v41  ;;  %v615_v44 = vmul.f32 %v1371_v40, %v613_v42  ;;  %v616_v47 = vmul.f32 %v614_v41, %v604_v30  ;;  %v1355_v30 = vld [vmem:[#allocation14 + $0x18] sm:$0xff]  }
 0x374   :  { %1372 = vrcp.f32 %v618_v43  ;;  %v619_v45 = vadd.f32 2.0, %v615_v44  ;;  %v617_v48 = vmul.f32 %v615_v44, %v605_v34  ;;  %v1359_v34 = vld [vmem:[#allocation14 + $0x38] sm:$0xff]  }
 0x376   :  { %1374 = vrcp.f32 %v619_v45 }
 0x37e   :  { %v1373_v46 = vpop.eup %1372 }
 0x37f   :  { %v622_v50 = vmul.f32 %v1373_v46, %v616_v47 }
 0x380   :  { %v1375_v49 = vpop.eup %1374 }
 0x381   :  { %v623_v51 = vmul.f32 %v1375_v49, %v617_v48 }
 0x383   :  { %v640_v52 = vpack.c.bf16 %v623_v51, %v622_v50 }
 0x385   :  { %1247 = vmatmul.mubr.bf16.vlgmr.msra.gmra.mrb[8].mxu0 %v640_v52 }
 0x386   :  { %1286 = vmatprep.mubr.msk.bf16.mxu0 %vm1613_vm0, %v1612_v0  ;;  %1271 = vmatpush3.bf16.msra.mxu0 %v1352_v26 }
 0x387   :  { %1272 = vmatprep.subr.bf16.mxu0 %v1612_v0 }
 0x38a   :  { %1273 = vmatpush3.bf16.msra.mxu0 %v1353_v28 }
 0x38b   :  { %1274 = vmatprep.subr.bf16.mxu0 %v1612_v0 }
 0x38e   :  { %1275 = vmatpush3.bf16.msra.mxu0 %v1354_v29 }
 0x38f   :  { %1276 = vmatprep.subr.bf16.mxu0 %v1612_v0 }
 0x392   :  { %1277 = vmatpush3.bf16.msra.mxu0 %v1355_v30 }
 0x393   :  { %1278 = vmatprep.subr.bf16.mxu0 %v1612_v0 }
 0x396   :  { %1279 = vmatpush3.bf16.msra.mxu0 %v1356_v31 }
 0x397   :  { %1280 = vmatprep.subr.bf16.mxu0 %v1612_v0 }
 0x39a   :  { %1281 = vmatpush3.bf16.msra.mxu0 %v1357_v32 }
 0x39b   :  { %1282 = vmatprep.subr.bf16.mxu0 %v1612_v0 }
 0x39e   :  { %1283 = vmatpush3.bf16.msra.mxu0 %v1358_v33 }
 0x39f   :  { %1284 = vmatprep.subr.bf16.mxu0 %v1612_v0 }
 0x3a2   :  { %1285 = vmatpush3.bf16.msra.mxu0 %v1359_v34 }
 0x458   :  { %v727_v63 = vpop.f32.mrb[8].mxu0 }
 0x459   :  { %v728_v1 = vadd.f32 %v727_v63, %v644_v62  ;;  %v1248_v2 = vpop.f32.mrb[9].mxu0 }
 0x45a   :  { %v730_v3 = vpop.f32.mrb[10].mxu0 }
 0x45b   :  { %v734_v4 = vmin.f32 %v728_v1, 20.0  ;;  %v731_v5 = vadd.f32 %v730_v3, %v644_v62  ;;  %v1249_v6 = vpop.f32.mrb[11].mxu0  ;;  %v900_v62 = vrot.slane %v1852_v27, %v899_v61 }
 0x45d   :  { %v736_v7 = vmul.f32 1.442695, %v734_v4  ;;  %v735_v8 = vmin.f32 %v731_v5, 20.0 }
 0x45f   :  { %1376 = vpow2.f32 %v736_v7  ;;  %v738_v10 = vmul.f32 1.442695, %v735_v8 }
 0x461   :  { %1378 = vpow2.f32 %v738_v10 }
 0x469   :  { %v1377_v9 = vpop.eup %1376 }
 0x46a   :  { %v740_v11 = vadd.f32 2.0, %v1377_v9 }
 0x46b   :  { %v1379_v12 = vpop.eup %1378 }
 0x46c   :  { %v742_v13 = vmul.f32 %v1377_v9, %v740_v11  ;;  %v741_v14 = vadd.f32 2.0, %v1379_v12 }
 0x46e   :  { %v746_v15 = vadd.f32 2.0, %v742_v13  ;;  %v743_v16 = vmul.f32 %v1379_v12, %v741_v14  ;;  %v744_v19 = vmul.f32 %v742_v13, %v728_v1 }
 0x470   :  { %1380 = vrcp.f32 %v746_v15  ;;  %v747_v17 = vadd.f32 2.0, %v743_v16  ;;  %v745_v20 = vmul.f32 %v743_v16, %v731_v5 }
 0x472   :  { %1382 = vrcp.f32 %v747_v17 }
 0x47a   :  { %v1381_v18 = vpop.eup %1380 }
 0x47b   :  { %v750_v22 = vmul.f32 %v1381_v18, %v744_v19 }
 0x47c   :  { %v1383_v21 = vpop.eup %1382 }
 0x47d   :  { %v751_v23 = vmul.f32 %v1383_v21, %v745_v20 }
 0x47f   :  { %v768_v24 = vpack.c.bf16 %v751_v23, %v750_v22 }
 0x481   :  { %1267 = vmatmul.mubr.bf16.vlgmr.msra.gmra.mrb[8].mxu1 %v768_v24 }
 0x554   :  { %v855_v37 = vpop.f32.mrb[8].mxu1 }
 0x555   :  { %v856_v38 = vadd.f32 %v855_v37, %v772_v36  ;;  %v1268_v39 = vpop.f32.mrb[9].mxu1 }
 0x556   :  { %v858_v40 = vpop.f32.mrb[10].mxu1 }
 0x557   :  { %v862_v41 = vmin.f32 %v856_v38, 20.0  ;;  %v859_v42 = vadd.f32 %v858_v40, %v772_v36  ;;  %v1269_v43 = vpop.f32.mrb[11].mxu1 }
 0x559   :  { %v864_v44 = vmul.f32 1.442695, %v862_v41  ;;  %v863_v45 = vmin.f32 %v859_v42, 20.0 }
 0x55b   :  { %1384 = vpow2.f32 %v864_v44  ;;  %v866_v46 = vmul.f32 1.442695, %v863_v45 }
 0x55d   :  { %1386 = vpow2.f32 %v866_v46 }
 0x565   :  { %v1385_v47 = vpop.eup %1384 }
 0x566   :  { %v868_v0 = vadd.f32 2.0, %v1385_v47 }
 0x567   :  { %v1387_v48 = vpop.eup %1386 }
 0x568   :  { %v870_v49 = vmul.f32 %v1385_v47, %v868_v0  ;;  %v869_v50 = vadd.f32 2.0, %v1387_v48 }
 0x56a   :  { %v874_v51 = vadd.f32 2.0, %v870_v49  ;;  %v871_v52 = vmul.f32 %v1387_v48, %v869_v50  ;;  %v872_v55 = vmul.f32 %v870_v49, %v856_v38 }
 0x56c   :  { %1388 = vrcp.f32 %v874_v51  ;;  %v875_v53 = vadd.f32 2.0, %v871_v52  ;;  %v873_v56 = vmul.f32 %v871_v52, %v859_v42 }
 0x56e   :  { %1390 = vrcp.f32 %v875_v53 }
 0x576   :  { %v1389_v54 = vpop.eup %1388 }
 0x577   :  { %v878_v58 = vmul.f32 %v1389_v54, %v872_v55 }
 0x578   :  { %v1391_v57 = vpop.eup %1390 }
 0x579   :  { %v879_v59 = vmul.f32 %v1391_v57, %v873_v56 }
 0x57b   :  { %v896_v60 = vpack.c.bf16 %v879_v59, %v878_v58 }
 0x57d   :  { %1287 = vmatmul.mubr.bf16.vlgmr.msra.gmra.mrb[12].mxu0 %v896_v60 }
 0x650   :  { %v983_v63 = vpop.f32.mrb[12].mxu0 }
 0x651   :  { %v1288_v1 = vpop.f32.mrb[13].mxu0  ;;  %v984_v3 = vadd.f32 %v983_v63, %v900_v62 }
 0x652   :  { %v986_v2 = vpop.f32.mrb[14].mxu0 }
 0x653   :  { %v987_v4 = vadd.f32 %v986_v2, %v900_v62  ;;  %v1289_v5 = vpop.f32.mrb[15].mxu0 }
 0x655   :  { %v1085_v6 = vpack.c.bf16 %v987_v4, %v984_v3 }
 0x657   :  { %1086 = vst [vmem:[#allocation16] sm:$0xff] %v1085_v6  }
 0x658   :  { %1579 = shalt.err (!%p1576_p12)
}
 0x659   :  { %s1580_s23 = scalar_lea.hbm %s1930_s9, 128 }
 0x65a   :  { %p1581_p13 = scmp.ne.s32.totalorder %s1930_s9, %s1580_s23  ;;  %p1584_p0 = scmp.lt.u32.totalorder %s1580_s23, %s1930_s9 }
 0x65c   :  { %p1586_p1 = pnand %p1584_p0, %p1581_p13 }
 0x65e   :  { %1589 = shalt.err (!%p1586_p1)
}
 0x65f   :  { %1011 = dma.vmem_to_hbm [thread:$0]  %s1006_s15, 128, %s1930_s9, [#allocation4], %s1604_s21, %s1604_s21, %s1605_s22  }
 0x660   :  { %1600 = dma.done.wait [#allocation4], 128  }
 0x661   :  { %1601 = vsyncadd [#allocation4], 4294967168 }
 0x662   :  { %1015 = vsyncpa [#allocation3], 1 }
 0x663   :  { %1016 = vsyncpa [#allocation6], 1 }
 0x664   :  { %1017 = vsyncpa [#allocation9], 1 }
 0x665   :  { %1018 = vsyncpa [#allocation12], 1 }
 0x666   :  { %1019 = vsyncpa [#allocation15], 1 }
 0x667   :  { %1020 = vsyncpa [#allocation4], 1 }

// kernel: tpu_custom_call.1
= control target key start
LH: loop header
LB: loop body
LE: loop exit
PB: predicated region body
PF: predicated region fallthrough
CT: control target
= control target key end

     0   :  { %14 = vsyncpa [#allocation3], 0  ;;  %s1921_s0 = inlined_call_operand.hbm [shape: bf16[16,128], index: 0, kind: input, shape index: {}]   ;;  %s1922_s1 = inlined_call_operand.hbm [shape: bf16[128,128], index: 1, kind: input, shape index: {}]   ;;  %s1923_s2 = inlined_call_operand.hbm [shape: bf16[128,128], index: 2, kind: input, shape index: {}]   ;;  %s1924_s3 = inlined_call_operand.hbm [shape: bf16[128,128], index: 3, kind: input, shape index: {}]   ;;  %s1925_s4 = inlined_call_operand.hbm [shape: bf16[128,128], index: 4, kind: input, shape index: {}]   ;;  %s1926_s5 = inlined_call_operand.hbm [shape: bf16[128,128], index: 5, kind: input, shape index: {}]   ;;  %s1927_s6 = inlined_call_operand.hbm [shape: bf16[128,128], index: 6, kind: input, shape index: {}]   ;;  %s1928_s7 = inlined_call_operand.hbm [shape: bf16[128,128], index: 7, kind: input, shape index: {}]   ;;  %s1929_s8 = inlined_call_operand.vmem [shape: f32[8,128], index: 8, kind: input, shape index: {}]   ;;  %s1930_s9 = inlined_call_operand.hbm [shape: bf16[16,128], index: 9, kind: output, shape index: {}]  }
   0x1   :  { %15 = vsyncpa [#allocation6], 0 }
   0x2   :  { %16 = vsyncpa [#allocation9], 0 }
   0x3   :  { %17 = vsyncpa [#allocation12], 0 }
   0x4   :  { %18 = vsyncpa [#allocation15], 0 }
   0x5   :  { %19 = vsyncpa [#allocation4], 0  ;;  %s1602_s30 = smov [#allocation5]   ;;  %s1603_s11 = smov [#allocation8]  }
   0x6   :  { %s37_s10 = sshll.u32 %s1602_s30, 4  ;;  %s61_s12 = sshll.u32 %s1603_s11, 4  ;;  %s38_s10 = int_to_ptr.vmem [resolvable:$true] %s37_s10  ;;  %s1665_s12 = int_to_ptr.vmem [resolvable:$true] %s61_s12 }
   0x7   :  { %s1392_s15 = scalar_lea.hbm %s1922_s1, 1024 }
   0x8   :  { %p1393_p0 = scmp.ne.s32.totalorder %s1922_s1, %s1392_s15  ;;  %p1396_p1 = scmp.lt.u32.totalorder %s1392_s15, %s1922_s1 }
   0xa   :  { %p1398_p2 = pnand %p1396_p1, %p1393_p0 }
   0xc   :  { %1401 = shalt.err (!%p1398_p2)
}
   0xd   :  { %s1402_s20 = scalar_lea.vmem %s38_s10, 1024  ;;  %p1407_p4 = scmp.lt.s32.totalorder %s38_s10, %s38_s10 }
   0xe   :  { %p1403_p3 = scmp.ne.s32.totalorder %s38_s10, %s1402_s20  ;;  %p1408_p5 = scmp.lt.s32.totalorder %s1402_s20, %s1402_s20 }
  0x10   :  { %p1409_p6 = por %p1408_p5, %p1407_p4 }
  0x12   :  { %p1410_p7 = pnand %p1409_p6, %p1403_p3 }
  0x14   :  { %1413 = shalt.err (!%p1410_p7)
}
  0x15   :  { %s1604_s21 = smov 64   ;;  %s1605_s22 = smov 4  }
  0x16   :  { %43 = dma.hbm_to_vmem [thread:$0]  %s1922_s1, 1024, %s38_s10, [#allocation6], %s1604_s21, %s1604_s21, %s1605_s22  }
  0x17   :  { %s1414_s27 = scalar_lea.hbm %s1924_s3, 1024 }
  0x18   :  { %p1415_p8 = scmp.ne.s32.totalorder %s1924_s3, %s1414_s27  ;;  %p1418_p9 = scmp.lt.u32.totalorder %s1414_s27, %s1924_s3 }
  0x1a   :  { %p1420_p10 = pnand %p1418_p9, %p1415_p8 }
  0x1c   :  { %1423 = shalt.err (!%p1420_p10)
}
  0x1d   :  { %s1424_s13 = scalar_lea.vmem %s1665_s12, 1024  ;;  %p1429_p12 = scmp.lt.s32.totalorder %s1665_s12, %s1665_s12 }
  0x1e   :  { %p1425_p11 = scmp.ne.s32.totalorder %s1665_s12, %s1424_s13  ;;  %p1430_p13 = scmp.lt.s32.totalorder %s1424_s13, %s1424_s13 }
  0x20   :  { %p1431_p0 = por %p1430_p13, %p1429_p12 }
  0x22   :  { %p1432_p1 = pnand %p1431_p0, %p1425_p11 }
  0x24   :  { %1435 = shalt.err (!%p1432_p1)
}
  0x25   :  { %67 = dma.hbm_to_vmem [thread:$0]  %s1924_s3, 1024, %s1665_s12, [#allocation9], %s1604_s21, %s1604_s21, %s1605_s22  }
  0x26   :  { %s1606_s14 = smov [#allocation11]   ;;  %s1607_s16 = smov [#allocation2]  }
  0x27   :  { %s85_s15 = sshll.u32 %s1606_s14, 4  ;;  %s25_s17 = sshll.u32 %s1607_s16, 4  ;;  %s86_s15 = int_to_ptr.vmem [resolvable:$true] %s85_s15  ;;  %s1702_s17 = int_to_ptr.vmem [resolvable:$true] %s25_s17 }
  0x28   :  { %s1436_s20 = scalar_lea.hbm %s1926_s5, 1024 }
  0x29   :  { %p1437_p2 = scmp.ne.s32.totalorder %s1926_s5, %s1436_s20  ;;  %p1440_p3 = scmp.lt.u32.totalorder %s1436_s20, %s1926_s5 }
  0x2b   :  { %p1442_p4 = pnand %p1440_p3, %p1437_p2 }
  0x2d   :  { %1445 = shalt.err (!%p1442_p4)
}
  0x2e   :  { %s1446_s3 = scalar_lea.vmem %s86_s15, 1024  ;;  %p1451_p6 = scmp.lt.s32.totalorder %s86_s15, %s86_s15 }
  0x2f   :  { %p1447_p5 = scmp.ne.s32.totalorder %s86_s15, %s1446_s3  ;;  %p1452_p7 = scmp.lt.s32.totalorder %s1446_s3, %s1446_s3 }
  0x31   :  { %p1453_p8 = por %p1452_p7, %p1451_p6 }
  0x33   :  { %p1454_p9 = pnand %p1453_p8, %p1447_p5 }
  0x35   :  { %1457 = shalt.err (!%p1454_p9)
}
  0x36   :  { %91 = dma.hbm_to_vmem [thread:$0]  %s1926_s5, 1024, %s86_s15, [#allocation12], %s1604_s21, %s1604_s21, %s1605_s22  }
  0x37   :  { %s1458_s30 = scalar_lea.hbm %s1921_s0, 128 }
  0x38   :  { %p1459_p10 = scmp.ne.s32.totalorder %s1921_s0, %s1458_s30  ;;  %p1462_p11 = scmp.lt.u32.totalorder %s1458_s30, %s1921_s0 }
  0x3a   :  { %p1464_p12 = pnand %p1462_p11, %p1459_p10 }
  0x3c   :  { %1467 = shalt.err (!%p1464_p12)
}
  0x3d   :  { %s1468_s14 = scalar_lea.vmem %s1702_s17, 128  ;;  %p1473_p0 = scmp.lt.s32.totalorder %s1702_s17, %s1702_s17 }
  0x3e   :  { %p1469_p13 = scmp.ne.s32.totalorder %s1702_s17, %s1468_s14  ;;  %p1474_p1 = scmp.lt.s32.totalorder %s1468_s14, %s1468_s14 }
  0x40   :  { %p1475_p2 = por %p1474_p1, %p1473_p0 }
  0x42   :  { %p1476_p3 = pnand %p1475_p2, %p1469_p13 }
  0x44   :  { %1479 = shalt.err (!%p1476_p3)
}
  0x45   :  { %31 = dma.hbm_to_vmem [thread:$0]  %s1921_s0, 128, %s1702_s17, [#allocation3], %s1604_s21, %s1604_s21, %s1605_s22  }
  0x46   :  { %s1608_s16 = smov [#allocation7]   ;;  %s1609_s19 = smov [#allocation10]  }
  0x47   :  { %s49_s18 = sshll.u32 %s1608_s16, 4  ;;  %s73_s20 = sshll.u32 %s1609_s19, 4  ;;  %s50_s18 = int_to_ptr.vmem [resolvable:$true] %s49_s18  ;;  %s1739_s20 = int_to_ptr.vmem [resolvable:$true] %s73_s20 }
  0x48   :  { %s1480_s25 = scalar_lea.hbm %s1923_s2, 1024 }
  0x49   :  { %p1481_p4 = scmp.ne.s32.totalorder %s1923_s2, %s1480_s25  ;;  %p1484_p5 = scmp.lt.u32.totalorder %s1480_s25, %s1923_s2 }
  0x4b   :  { %p1486_p6 = pnand %p1484_p5, %p1481_p4 }
  0x4d   :  { %1489 = shalt.err (!%p1486_p6)
}
  0x4e   :  { %s1490_s0 = scalar_lea.vmem %s50_s18, 1024  ;;  %p1495_p8 = scmp.lt.s32.totalorder %s50_s18, %s50_s18 }
  0x4f   :  { %p1491_p7 = scmp.ne.s32.totalorder %s50_s18, %s1490_s0  ;;  %p1496_p9 = scmp.lt.s32.totalorder %s1490_s0, %s1490_s0 }
  0x51   :  { %p1497_p10 = por %p1496_p9, %p1495_p8 }
  0x53   :  { %p1498_p11 = pnand %p1497_p10, %p1491_p7 }
  0x55   :  { %1501 = shalt.err (!%p1498_p11)
}
  0x56   :  { %55 = dma.hbm_to_vmem [thread:$0]  %s1923_s2, 1024, %s50_s18, [#allocation6], %s1604_s21, %s1604_s21, %s1605_s22  }
  0x57   :  { %s1502_s11 = scalar_lea.hbm %s1925_s4, 1024 }
  0x58   :  { %p1503_p12 = scmp.ne.s32.totalorder %s1925_s4, %s1502_s11  ;;  %p1506_p13 = scmp.lt.u32.totalorder %s1502_s11, %s1925_s4 }
  0x5a   :  { %p1508_p0 = pnand %p1506_p13, %p1503_p12 }
  0x5c   :  { %1511 = shalt.err (!%p1508_p0)
}
  0x5d   :  { %s1512_s5 = scalar_lea.vmem %s1739_s20, 1024  ;;  %p1517_p2 = scmp.lt.s32.totalorder %s1739_s20, %s1739_s20 }
  0x5e   :  { %p1513_p1 = scmp.ne.s32.totalorder %s1739_s20, %s1512_s5  ;;  %p1518_p3 = scmp.lt.s32.totalorder %s1512_s5, %s1512_s5 }
  0x60   :  { %p1519_p4 = por %p1518_p3, %p1517_p2 }
  0x62   :  { %p1520_p5 = pnand %p1519_p4, %p1513_p1 }
  0x64   :  { %1523 = shalt.err (!%p1520_p5)
}
  0x65   :  { %79 = dma.hbm_to_vmem [thread:$0]  %s1925_s4, 1024, %s1739_s20, [#allocation9], %s1604_s21, %s1604_s21, %s1605_s22  }
  0x66   :  { %s1610_s16 = smov [#allocation13]   ;;  %s1611_s19 = smov [#allocation14]  }
  0x67   :  { %s97_s18 = sshll.u32 %s1610_s16, 4  ;;  %s109_s23 = sshll.u32 %s1611_s19, 4  ;;  %s98_s18 = int_to_ptr.vmem [resolvable:$true] %s97_s18  ;;  %s1776_s23 = int_to_ptr.vmem [resolvable:$true] %s109_s23 }
  0x68   :  { %s1524_s26 = scalar_lea.hbm %s1927_s6, 1024 }
  0x69   :  { %p1525_p6 = scmp.ne.s32.totalorder %s1927_s6, %s1524_s26  ;;  %p1528_p7 = scmp.lt.u32.totalorder %s1524_s26, %s1927_s6 }
  0x6b   :  { %p1530_p8 = pnand %p1528_p7, %p1525_p6 }
  0x6d   :  { %1533 = shalt.err (!%p1530_p8)
}
  0x6e   :  { %s1534_s4 = scalar_lea.vmem %s98_s18, 1024  ;;  %p1539_p10 = scmp.lt.s32.totalorder %s98_s18, %s98_s18 }
  0x6f   :  { %p1535_p9 = scmp.ne.s32.totalorder %s98_s18, %s1534_s4  ;;  %p1540_p11 = scmp.lt.s32.totalorder %s1534_s4, %s1534_s4 }
  0x71   :  { %p1541_p12 = por %p1540_p11, %p1539_p10 }
  0x73   :  { %p1542_p13 = pnand %p1541_p12, %p1535_p9 }
  0x75   :  { %1545 = shalt.err (!%p1542_p13)
}
  0x76   :  { %103 = dma.hbm_to_vmem [thread:$0]  %s1927_s6, 1024, %s98_s18, [#allocation12], %s1604_s21, %s1604_s21, %s1605_s22  }
  0x77   :  { %s1546_s30 = scalar_lea.hbm %s1928_s7, 1024 }
  0x78   :  { %p1547_p0 = scmp.ne.s32.totalorder %s1928_s7, %s1546_s30  ;;  %p1550_p1 = scmp.lt.u32.totalorder %s1546_s30, %s1928_s7 }
  0x7a   :  { %p1552_p2 = pnand %p1550_p1, %p1547_p0 }
  0x7c   :  { %1555 = shalt.err (!%p1552_p2)
}
  0x7d   :  { %s1556_s14 = scalar_lea.vmem %s1776_s23, 1024  ;;  %p1561_p4 = scmp.lt.s32.totalorder %s1776_s23, %s1776_s23 }
  0x7e   :  { %p1557_p3 = scmp.ne.s32.totalorder %s1776_s23, %s1556_s14  ;;  %p1562_p5 = scmp.lt.s32.totalorder %s1556_s14, %s1556_s14 }
  0x80   :  { %p1563_p6 = por %p1562_p5, %p1561_p4 }
  0x82   :  { %p1564_p7 = pnand %p1563_p6, %p1557_p3 }
  0x84   :  { %1567 = shalt.err (!%p1564_p7)
}
  0x85   :  { %115 = dma.hbm_to_vmem [thread:$0]  %s1928_s7, 1024, %s1776_s23, [#allocation15], %s1604_s21, %s1604_s21, %s1605_s22  }
  0x86   :  { %1590 = dma.done.wait [#allocation3], 128  }
  0x87   :  { %1591 = vsyncadd [#allocation3], 4294967168 }
  0x88   :  { %1592 = dma.done.wait [#allocation6], 2048  }
  0x89   :  { %1593 = vsyncadd [#allocation6], 4294965248 }
  0x8a   :  { %1594 = dma.done.wait [#allocation9], 2048  }
  0x8b   :  { %1595 = vsyncadd [#allocation9], 4294965248 }
  0x8c   :  { %1596 = dma.done.wait [#allocation12], 2048  }
  0x8d   :  { %1597 = vsyncadd [#allocation12], 4294965248 }
  0x8e   :  { %1598 = dma.done.wait [#allocation15], 1024  }
  0x8f   :  { %1599 = vsyncadd [#allocation15], 4294966272  ;;  %v1612_v0 = vmov 0.0   ;;  %vm1613_vm0 = vmmov 0   ;;  %v1303_v1 = vld [vmem:[#allocation5] sm:$0xff]   ;;  %v1304_v2 = vld [vmem:[#allocation5 + $0x8] sm:$0xff]   ;;  %v162_v24 = vlaneseq }
  0x90   :  { %1150 = vmatprep.subr.bf16.mxu0 %v1612_v0  ;;  %1166 = vmatprep.mubr.msk.bf16.mxu0 %vm1613_vm0, %v1612_v0  ;;  %v1305_v3 = vld [vmem:[#allocation5 + $0x10] sm:$0xff]   ;;  %v1306_v4 = vld [vmem:[#allocation5 + $0x18] sm:$0xff]   ;;  %v1307_v5 = vld [vmem:[#allocation5 + $0x20] sm:$0xff]  }
  0x91   :  { %1170 = vmatprep.subr.bf16.mxu1 %v1612_v0  ;;  %1186 = vmatprep.mubr.msk.bf16.mxu1 %vm1613_vm0, %v1612_v0  ;;  %v1308_v6 = vld [vmem:[#allocation5 + $0x28] sm:$0xff]   ;;  %v1309_v7 = vld [vmem:[#allocation5 + $0x30] sm:$0xff]   ;;  %v1310_v8 = vld [vmem:[#allocation5 + $0x38] sm:$0xff]   ;;  %v1846_v25 = vshrl.u32 %v162_v24, 7 }
  0x92   :  { %1151 = vmatpush3.bf16.msra.mxu0 %v1303_v1  ;;  %v1826_v9 = vld [vmem:[#allocation2] sm:$0xff]   ;;  %v1312_v10 = vld [vmem:[#allocation7] sm:$0xff]   ;;  %v1313_v11 = vld [vmem:[#allocation7 + $0x8] sm:$0xff]  }
  0x93   :  { %1152 = vmatprep.subr.bf16.mxu0 %v1612_v0  ;;  %1171 = vmatpush3.bf16.msra.mxu1 %v1312_v10  ;;  %v1314_v12 = vld [vmem:[#allocation7 + $0x10] sm:$0xff]   ;;  %v1315_v13 = vld [vmem:[#allocation7 + $0x18] sm:$0xff]   ;;  %v1316_v14 = vld [vmem:[#allocation7 + $0x20] sm:$0xff]   ;;  %v164_v26 = vsub.s32 0, %v1846_v25  ;;  %v298_v1 = vsub.s32 1, %v1846_v25 }
  0x94   :  { %1172 = vmatprep.subr.bf16.mxu1 %v1612_v0  ;;  %v1317_v15 = vld [vmem:[#allocation7 + $0x28] sm:$0xff]   ;;  %v1318_v16 = vld [vmem:[#allocation7 + $0x30] sm:$0xff]   ;;  %v1319_v17 = vld [vmem:[#allocation7 + $0x38] sm:$0xff]  }
  0x95   :  { %v1321_v18 = vld [vmem:[#allocation10] sm:$0xff]   ;;  %v1323_v19 = vld [vmem:[#allocation10 + $0x8] sm:$0xff]   ;;  %v1325_v20 = vld [vmem:[#allocation10 + $0x10] sm:$0xff]  }
  0x96   :  { %1153 = vmatpush3.bf16.msra.mxu0 %v1304_v2  ;;  %v1327_v21 = vld [vmem:[#allocation10 + $0x18] sm:$0xff]   ;;  %v1329_v22 = vld [vmem:[#allocation10 + $0x20] sm:$0xff]   ;;  %v1331_v23 = vld [vmem:[#allocation10 + $0x28] sm:$0xff]  }
  0x97   :  { %1154 = vmatprep.subr.bf16.mxu0 %v1612_v0  ;;  %1173 = vmatpush3.bf16.msra.mxu1 %v1313_v11  ;;  %v1852_v27 = vld [vmem:[%s1929_s8] sm:$0xff]  ;;  %v1320_v53 = vld [vmem:[#allocation8] sm:$0xff]   ;;  %v1322_v55 = vld [vmem:[#allocation8 + $0x8] sm:$0xff]   ;;  %s1614_s8 = smov [#allocation16]  }
  0x98   :  { %1174 = vmatprep.subr.bf16.mxu1 %v1612_v0  ;;  %v165_v28 = vrot.slane %v1852_v27, %v164_v26  ;;  %v1324_v56 = vld [vmem:[#allocation8 + $0x10] sm:$0xff]   ;;  %v1326_v57 = vld [vmem:[#allocation8 + $0x18] sm:$0xff]   ;;  %v1328_v58 = vld [vmem:[#allocation8 + $0x20] sm:$0xff]   ;;  %v299_v2 = vrot.slane %v1852_v27, %v298_v1  ;;  %s1005_s15 = sshll.u32 %s1614_s8, 4  ;;  %s1006_s15 = int_to_ptr.vmem [resolvable:$true] %s1005_s15 }
  0x99   :  { %v1330_v59 = vld [vmem:[#allocation8 + $0x28] sm:$0xff]   ;;  %v1332_v60 = vld [vmem:[#allocation8 + $0x30] sm:$0xff]   ;;  %v1334_v62 = vld [vmem:[#allocation8 + $0x38] sm:$0xff]   ;;  %s1568_s16 = scalar_lea.vmem %s1006_s15, 128  ;;  %p1573_p9 = scmp.lt.s32.totalorder %s1006_s15, %s1006_s15 }
  0x9a   :  { %1155 = vmatpush3.bf16.msra.mxu0 %v1305_v3  ;;  %v1333_v61 = vld [vmem:[#allocation10 + $0x30] sm:$0xff]   ;;  %v1335_v63 = vld [vmem:[#allocation10 + $0x38] sm:$0xff]   ;;  %p1569_p8 = scmp.ne.s32.totalorder %s1006_s15, %s1568_s16  ;;  %p1574_p10 = scmp.lt.s32.totalorder %s1568_s16, %s1568_s16 }
  0x9b   :  { %1156 = vmatprep.subr.bf16.mxu0 %v1612_v0  ;;  %1175 = vmatpush3.bf16.msra.mxu1 %v1314_v12 }
  0x9c   :  { %1176 = vmatprep.subr.bf16.mxu1 %v1612_v0  ;;  %p1575_p11 = por %p1574_p10, %p1573_p9 }
  0x9e   :  { %1157 = vmatpush3.bf16.msra.mxu0 %v1306_v4  ;;  %p1576_p12 = pnand %p1575_p11, %p1569_p8 }
  0x9f   :  { %1158 = vmatprep.subr.bf16.mxu0 %v1612_v0  ;;  %1177 = vmatpush3.bf16.msra.mxu1 %v1315_v13 }
  0xa0   :  { %1178 = vmatprep.subr.bf16.mxu1 %v1612_v0 }
  0xa2   :  { %1159 = vmatpush3.bf16.msra.mxu0 %v1307_v5 }
  0xa3   :  { %1160 = vmatprep.subr.bf16.mxu0 %v1612_v0  ;;  %1179 = vmatpush3.bf16.msra.mxu1 %v1316_v14  ;;  %v1336_v14 = vld [vmem:[#allocation11] sm:$0xff]  }
  0xa4   :  { %1180 = vmatprep.subr.bf16.mxu1 %v1612_v0 }
  0xa6   :  { %1161 = vmatpush3.bf16.msra.mxu0 %v1308_v6 }
  0xa7   :  { %1162 = vmatprep.subr.bf16.mxu0 %v1612_v0  ;;  %1181 = vmatpush3.bf16.msra.mxu1 %v1317_v15  ;;  %v1337_v15 = vld [vmem:[#allocation11 + $0x8] sm:$0xff]  }
  0xa8   :  { %1182 = vmatprep.subr.bf16.mxu1 %v1612_v0 }
  0xaa   :  { %1163 = vmatpush3.bf16.msra.mxu0 %v1309_v7 }
  0xab   :  { %1164 = vmatprep.subr.bf16.mxu0 %v1612_v0  ;;  %1183 = vmatpush3.bf16.msra.mxu1 %v1318_v16  ;;  %v1338_v16 = vld [vmem:[#allocation11 + $0x10] sm:$0xff]  }
  0xac   :  { %1184 = vmatprep.subr.bf16.mxu1 %v1612_v0 }
  0xae   :  { %1165 = vmatpush3.bf16.msra.mxu0 %v1310_v8 }
  0xaf   :  { %1190 = vmatprep.subr.bf16.mxu0 %v1612_v0  ;;  %1185 = vmatpush3.bf16.msra.mxu1 %v1319_v17  ;;  %v1339_v17 = vld [vmem:[#allocation11 + $0x18] sm:$0xff]  }
  0xb0   :  { %1210 = vmatprep.subr.bf16.mxu1 %v1612_v0 }
  0xb1   :  { %1167 = vmatmul.mubr.bf16.vlgmr.msra.gmra.mrb[0].mxu0 %v1826_v9 }
  0xb2   :  { %1206 = vmatprep.mubr.msk.bf16.mxu0 %vm1613_vm0, %v1612_v0  ;;  %1191 = vmatpush3.bf16.msra.mxu0 %v1321_v18  ;;  %v1340_v18 = vld [vmem:[#allocation11 + $0x20] sm:$0xff]  }
  0xb3   :  { %1192 = vmatprep.subr.bf16.mxu0 %v1612_v0 }
  0xb6   :  { %1193 = vmatpush3.bf16.msra.mxu0 %v1323_v19  ;;  %v1341_v19 = vld [vmem:[#allocation11 + $0x28] sm:$0xff]  }
  0xb7   :  { %1194 = vmatprep.subr.bf16.mxu0 %v1612_v0 }
  0xba   :  { %1195 = vmatpush3.bf16.msra.mxu0 %v1325_v20  ;;  %v1342_v20 = vld [vmem:[#allocation11 + $0x30] sm:$0xff]  }
  0xbb   :  { %1196 = vmatprep.subr.bf16.mxu0 %v1612_v0 }
  0xbe   :  { %1197 = vmatpush3.bf16.msra.mxu0 %v1327_v21  ;;  %v1343_v21 = vld [vmem:[#allocation11 + $0x38] sm:$0xff]  }
  0xbf   :  { %1198 = vmatprep.subr.bf16.mxu0 %v1612_v0 }
  0xc2   :  { %1199 = vmatpush3.bf16.msra.mxu0 %v1329_v22  ;;  %v602_v22 = vsub.s32 2, %v1846_v25 }
  0xc3   :  { %1200 = vmatprep.subr.bf16.mxu0 %v1612_v0 }
  0xc6   :  { %1201 = vmatpush3.bf16.msra.mxu0 %v1331_v23  ;;  %v603_v23 = vrot.slane %v1852_v27, %v602_v22 }
  0xc7   :  { %1202 = vmatprep.subr.bf16.mxu0 %v1612_v0 }
  0xca   :  { %1203 = vmatpush3.bf16.msra.mxu0 %v1333_v61  ;;  %v643_v61 = vsub.s32 3, %v1846_v25 }
  0xcb   :  { %1204 = vmatprep.subr.bf16.mxu0 %v1612_v0 }
  0xce   :  { %1205 = vmatpush3.bf16.msra.mxu0 %v1335_v63 }
  0xcf   :  { %1230 = vmatprep.subr.bf16.mxu0 %v1612_v0 }
 0x184   :  { %v254_v29 = vpop.f32.mrb[0].mxu0 }
 0x185   :  { %v255_v30 = vadd.f32 %v254_v29, %v165_v28  ;;  %v1168_v31 = vpop.f32.mrb[1].mxu0 }
 0x186   :  { %v257_v32 = vpop.f32.mrb[2].mxu0 }
 0x187   :  { %v261_v33 = vmin.f32 %v255_v30, 20.0  ;;  %v258_v34 = vadd.f32 %v257_v32, %v165_v28  ;;  %v1169_v35 = vpop.f32.mrb[3].mxu0 }
 0x189   :  { %v263_v36 = vmul.f32 1.442695, %v261_v33  ;;  %v262_v37 = vmin.f32 %v258_v34, 20.0 }
 0x18b   :  { %1360 = vpow2.f32 %v263_v36  ;;  %v265_v38 = vmul.f32 1.442695, %v262_v37 }
 0x18d   :  { %1362 = vpow2.f32 %v265_v38 }
 0x195   :  { %v1361_v39 = vpop.eup %1360 }
 0x196   :  { %v267_v40 = vadd.f32 2.0, %v1361_v39 }
 0x197   :  { %v1363_v41 = vpop.eup %1362 }
 0x198   :  { %v269_v42 = vmul.f32 %v1361_v39, %v267_v40  ;;  %v268_v43 = vadd.f32 2.0, %v1363_v41 }
 0x19a   :  { %v273_v44 = vadd.f32 2.0, %v269_v42  ;;  %v270_v45 = vmul.f32 %v1363_v41, %v268_v43  ;;  %v271_v48 = vmul.f32 %v269_v42, %v255_v30 }
 0x19c   :  { %1364 = vrcp.f32 %v273_v44  ;;  %v274_v46 = vadd.f32 2.0, %v270_v45  ;;  %v272_v49 = vmul.f32 %v270_v45, %v258_v34 }
 0x19e   :  { %1366 = vrcp.f32 %v274_v46 }
 0x1a6   :  { %v1365_v47 = vpop.eup %1364 }
 0x1a7   :  { %v277_v51 = vmul.f32 %v1365_v47, %v271_v48 }
 0x1a8   :  { %v1367_v50 = vpop.eup %1366 }
 0x1a9   :  { %v278_v52 = vmul.f32 %v1367_v50, %v272_v49 }
 0x1ab   :  { %v295_v54 = vpack.c.bf16 %v278_v52, %v277_v51 }
 0x1ad   :  { %1187 = vmatmul.mubr.bf16.vlgmr.msra.gmra.mrb[0].mxu1 %v295_v54  ;;  %v1345_v54 = vld [vmem:[#allocation13 + $0x8] sm:$0xff]  }
 0x1ae   :  { %1211 = vmatpush3.bf16.msra.mxu1 %v1320_v53  ;;  %1226 = vmatprep.mubr.msk.bf16.mxu1 %vm1613_vm0, %v1612_v0  ;;  %v1344_v53 = vld [vmem:[#allocation13] sm:$0xff]  }
 0x1af   :  { %1212 = vmatprep.subr.bf16.mxu1 %v1612_v0 }
 0x1b2   :  { %1213 = vmatpush3.bf16.msra.mxu1 %v1322_v55  ;;  %v1346_v55 = vld [vmem:[#allocation13 + $0x10] sm:$0xff]  }
 0x1b3   :  { %1214 = vmatprep.subr.bf16.mxu1 %v1612_v0 }
 0x1b6   :  { %1215 = vmatpush3.bf16.msra.mxu1 %v1324_v56  ;;  %v1347_v56 = vld [vmem:[#allocation13 + $0x18] sm:$0xff]  }
 0x1b7   :  { %1216 = vmatprep.subr.bf16.mxu1 %v1612_v0 }
 0x1ba   :  { %1217 = vmatpush3.bf16.msra.mxu1 %v1326_v57  ;;  %v1348_v57 = vld [vmem:[#allocation13 + $0x20] sm:$0xff]  }
 0x1bb   :  { %1218 = vmatprep.subr.bf16.mxu1 %v1612_v0 }
 0x1be   :  { %1219 = vmatpush3.bf16.msra.mxu1 %v1328_v58  ;;  %v1349_v58 = vld [vmem:[#allocation13 + $0x28] sm:$0xff]  }
 0x1bf   :  { %1220 = vmatprep.subr.bf16.mxu1 %v1612_v0 }
 0x1c2   :  { %1221 = vmatpush3.bf16.msra.mxu1 %v1330_v59  ;;  %v1350_v59 = vld [vmem:[#allocation13 + $0x30] sm:$0xff]  }
 0x1c3   :  { %1222 = vmatprep.subr.bf16.mxu1 %v1612_v0 }
 0x1c6   :  { %1223 = vmatpush3.bf16.msra.mxu1 %v1332_v60  ;;  %v1351_v60 = vld [vmem:[#allocation13 + $0x38] sm:$0xff]  }
 0x1c7   :  { %1224 = vmatprep.subr.bf16.mxu1 %v1612_v0 }
 0x1ca   :  { %1225 = vmatpush3.bf16.msra.mxu1 %v1334_v62  ;;  %v644_v62 = vrot.slane %v1852_v27, %v643_v61  ;;  %v899_v61 = vsub.s32 5, %v1846_v25 }
 0x1cb   :  { %1250 = vmatprep.subr.bf16.mxu1 %v1612_v0 }
 0x1cd   :  { %1227 = vmatmul.mubr.bf16.vlgmr.msra.gmra.mrb[4].mxu1 %v1826_v9 }
 0x1ce   :  { %1266 = vmatprep.mubr.msk.bf16.mxu1 %vm1613_vm0, %v1612_v0  ;;  %1251 = vmatpush3.bf16.msra.mxu1 %v1344_v53 }
 0x1cf   :  { %1252 = vmatprep.subr.bf16.mxu1 %v1612_v0 }
 0x1d2   :  { %1253 = vmatpush3.bf16.msra.mxu1 %v1345_v54 }
 0x1d3   :  { %1254 = vmatprep.subr.bf16.mxu1 %v1612_v0 }
 0x1d6   :  { %1255 = vmatpush3.bf16.msra.mxu1 %v1346_v55 }
 0x1d7   :  { %1256 = vmatprep.subr.bf16.mxu1 %v1612_v0 }
 0x1da   :  { %1257 = vmatpush3.bf16.msra.mxu1 %v1347_v56 }
 0x1db   :  { %1258 = vmatprep.subr.bf16.mxu1 %v1612_v0 }
 0x1de   :  { %1259 = vmatpush3.bf16.msra.mxu1 %v1348_v57 }
 0x1df   :  { %1260 = vmatprep.subr.bf16.mxu1 %v1612_v0 }
 0x1e2   :  { %1261 = vmatpush3.bf16.msra.mxu1 %v1349_v58 }
 0x1e3   :  { %1262 = vmatprep.subr.bf16.mxu1 %v1612_v0 }
 0x1e6   :  { %1263 = vmatpush3.bf16.msra.mxu1 %v1350_v59 }
 0x1e7   :  { %1264 = vmatprep.subr.bf16.mxu1 %v1612_v0 }
 0x1ea   :  { %1265 = vmatpush3.bf16.msra.mxu1 %v1351_v60 }
 0x280   :  { %v382_v3 = vpop.f32.mrb[0].mxu1 }
 0x281   :  { %v1188_v4 = vpop.f32.mrb[1].mxu1  ;;  %v383_v6 = vadd.f32 %v382_v3, %v299_v2 }
 0x282   :  { %v385_v5 = vpop.f32.mrb[2].mxu1 }
 0x283   :  { %v386_v7 = vadd.f32 %v385_v5, %v299_v2  ;;  %v1189_v8 = vpop.f32.mrb[3].mxu1 }
 0x285   :  { %v421_v10 = vpack.c.bf16 %v386_v7, %v383_v6 }
 0x287   :  { %1207 = vmatmul.mubr.bf16.vlgmr.msra.gmra.mrb[4].mxu0 %v421_v10 }
 0x288   :  { %1246 = vmatprep.mubr.msk.bf16.mxu0 %vm1613_vm0, %v1612_v0  ;;  %1231 = vmatpush3.bf16.msra.mxu0 %v1336_v14 }
 0x289   :  { %1232 = vmatprep.subr.bf16.mxu0 %v1612_v0 }
 0x28c   :  { %1233 = vmatpush3.bf16.msra.mxu0 %v1337_v15 }
 0x28d   :  { %1234 = vmatprep.subr.bf16.mxu0 %v1612_v0 }
 0x290   :  { %1235 = vmatpush3.bf16.msra.mxu0 %v1338_v16 }
 0x291   :  { %1236 = vmatprep.subr.bf16.mxu0 %v1612_v0 }
 0x294   :  { %1237 = vmatpush3.bf16.msra.mxu0 %v1339_v17 }
 0x295   :  { %1238 = vmatprep.subr.bf16.mxu0 %v1612_v0 }
 0x298   :  { %1239 = vmatpush3.bf16.msra.mxu0 %v1340_v18 }
 0x299   :  { %1240 = vmatprep.subr.bf16.mxu0 %v1612_v0 }
 0x29c   :  { %1241 = vmatpush3.bf16.msra.mxu0 %v1341_v19 }
 0x29d   :  { %1242 = vmatprep.subr.bf16.mxu0 %v1612_v0 }
 0x2a0   :  { %v593_v9 = vpop.f32.mrb[4].mxu1  ;;  %1243 = vmatpush3.bf16.msra.mxu0 %v1342_v20 }
 0x2a1   :  { %v1228_v11 = vpop.f32.mrb[5].mxu1  ;;  %1244 = vmatprep.subr.bf16.mxu0 %v1612_v0 }
 0x2a2   :  { %v596_v12 = vpop.f32.mrb[6].mxu1 }
 0x2a3   :  { %v1229_v13 = vpop.f32.mrb[7].mxu1 }
 0x2a4   :  { %1245 = vmatpush3.bf16.msra.mxu0 %v1343_v21 }
 0x2a5   :  { %1270 = vmatprep.subr.bf16.mxu0 %v1612_v0 }
 0x35a   :  { %v504_v24 = vpop.f32.mrb[4].mxu0 }
 0x35b   :  { %v594_v26 = vadd.f32 %v593_v9, %v504_v24  ;;  %v1208_v28 = vpop.f32.mrb[5].mxu0 }
 0x35c   :  { %v507_v29 = vpop.f32.mrb[6].mxu0  ;;  %v1353_v28 = vld [vmem:[#allocation14 + $0x8] sm:$0xff]  }
 0x35d   :  { %v604_v30 = vadd.f32 %v603_v23, %v594_v26  ;;  %v597_v31 = vadd.f32 %v596_v12, %v507_v29  ;;  %v1209_v32 = vpop.f32.mrb[7].mxu0  ;;  %v1352_v26 = vld [vmem:[#allocation14] sm:$0xff]   ;;  %v1354_v29 = vld [vmem:[#allocation14 + $0x10] sm:$0xff]  }
 0x35e   :  { %v1357_v32 = vld [vmem:[#allocation14 + $0x28] sm:$0xff]  }
 0x35f   :  { %v606_v33 = vmin.f32 %v604_v30, 20.0  ;;  %v605_v34 = vadd.f32 %v603_v23, %v597_v31  ;;  %v1356_v31 = vld [vmem:[#allocation14 + $0x20] sm:$0xff]  }
 0x361   :  { %v608_v35 = vmul.f32 1.442695, %v606_v33  ;;  %v607_v36 = vmin.f32 %v605_v34, 20.0  ;;  %v1358_v33 = vld [vmem:[#allocation14 + $0x30] sm:$0xff]  }
 0x363   :  { %1368 = vpow2.f32 %v608_v35  ;;  %v610_v37 = vmul.f32 1.442695, %v607_v36  ;;  %v771_v35 = vsub.s32 4, %v1846_v25 }
 0x365   :  { %1370 = vpow2.f32 %v610_v37  ;;  %v772_v36 = vrot.slane %v1852_v27, %v771_v35 }
 0x36d   :  { %v1369_v38 = vpop.eup %1368 }
 0x36e   :  { %v612_v39 = vadd.f32 2.0, %v1369_v38 }
 0x36f   :  { %v1371_v40 = vpop.eup %1370 }
 0x370   :  { %v614_v41 = vmul.f32 %v1369_v38, %v612_v39  ;;  %v613_v42 = vadd.f32 2.0, %v1371_v40 }
 0x372   :  { %v618_v43 = vadd.f32 2.0, %v614_v41  ;;  %v615_v44 = vmul.f32 %v1371_v40, %v613_v42  ;;  %v616_v47 = vmul.f32 %v614_v41, %v604_v30  ;;  %v1355_v30 = vld [vmem:[#allocation14 + $0x18] sm:$0xff]  }
 0x374   :  { %1372 = vrcp.f32 %v618_v43  ;;  %v619_v45 = vadd.f32 2.0, %v615_v44  ;;  %v617_v48 = vmul.f32 %v615_v44, %v605_v34  ;;  %v1359_v34 = vld [vmem:[#allocation14 + $0x38] sm:$0xff]  }
 0x376   :  { %1374 = vrcp.f32 %v619_v45 }
 0x37e   :  { %v1373_v46 = vpop.eup %1372 }
 0x37f   :  { %v622_v50 = vmul.f32 %v1373_v46, %v616_v47 }
 0x380   :  { %v1375_v49 = vpop.eup %1374 }
 0x381   :  { %v623_v51 = vmul.f32 %v1375_v49, %v617_v48 }
 0x383   :  { %v640_v52 = vpack.c.bf16 %v623_v51, %v622_v50 }
 0x385   :  { %1247 = vmatmul.mubr.bf16.vlgmr.msra.gmra.mrb[8].mxu0 %v640_v52 }
 0x386   :  { %1286 = vmatprep.mubr.msk.bf16.mxu0 %vm1613_vm0, %v1612_v0  ;;  %1271 = vmatpush3.bf16.msra.mxu0 %v1352_v26 }
 0x387   :  { %1272 = vmatprep.subr.bf16.mxu0 %v1612_v0 }
 0x38a   :  { %1273 = vmatpush3.bf16.msra.mxu0 %v1353_v28 }
 0x38b   :  { %1274 = vmatprep.subr.bf16.mxu0 %v1612_v0 }
 0x38e   :  { %1275 = vmatpush3.bf16.msra.mxu0 %v1354_v29 }
 0x38f   :  { %1276 = vmatprep.subr.bf16.mxu0 %v1612_v0 }
 0x392   :  { %1277 = vmatpush3.bf16.msra.mxu0 %v1355_v30 }
 0x393   :  { %1278 = vmatprep.subr.bf16.mxu0 %v1612_v0 }
 0x396   :  { %1279 = vmatpush3.bf16.msra.mxu0 %v1356_v31 }
 0x397   :  { %1280 = vmatprep.subr.bf16.mxu0 %v1612_v0 }
 0x39a   :  { %1281 = vmatpush3.bf16.msra.mxu0 %v1357_v32 }
 0x39b   :  { %1282 = vmatprep.subr.bf16.mxu0 %v1612_v0 }
 0x39e   :  { %1283 = vmatpush3.bf16.msra.mxu0 %v1358_v33 }
 0x39f   :  { %1284 = vmatprep.subr.bf16.mxu0 %v1612_v0 }
 0x3a2   :  { %1285 = vmatpush3.bf16.msra.mxu0 %v1359_v34 }
 0x458   :  { %v727_v63 = vpop.f32.mrb[8].mxu0 }
 0x459   :  { %v728_v1 = vadd.f32 %v727_v63, %v644_v62  ;;  %v1248_v2 = vpop.f32.mrb[9].mxu0 }
 0x45a   :  { %v730_v3 = vpop.f32.mrb[10].mxu0 }
 0x45b   :  { %v734_v4 = vmin.f32 %v728_v1, 20.0  ;;  %v731_v5 = vadd.f32 %v730_v3, %v644_v62  ;;  %v1249_v6 = vpop.f32.mrb[11].mxu0  ;;  %v900_v62 = vrot.slane %v1852_v27, %v899_v61 }
 0x45d   :  { %v736_v7 = vmul.f32 1.442695, %v734_v4  ;;  %v735_v8 = vmin.f32 %v731_v5, 20.0 }
 0x45f   :  { %1376 = vpow2.f32 %v736_v7  ;;  %v738_v10 = vmul.f32 1.442695, %v735_v8 }
 0x461   :  { %1378 = vpow2.f32 %v738_v10 }
 0x469   :  { %v1377_v9 = vpop.eup %1376 }
 0x46a   :  { %v740_v11 = vadd.f32 2.0, %v1377_v9 }
 0x46b   :  { %v1379_v12 = vpop.eup %1378 }
 0x46c   :  { %v742_v13 = vmul.f32 %v1377_v9, %v740_v11  ;;  %v741_v14 = vadd.f32 2.0, %v1379_v12 }
 0x46e   :  { %v746_v15 = vadd.f32 2.0, %v742_v13  ;;  %v743_v16 = vmul.f32 %v1379_v12, %v741_v14  ;;  %v744_v19 = vmul.f32 %v742_v13, %v728_v1 }
 0x470   :  { %1380 = vrcp.f32 %v746_v15  ;;  %v747_v17 = vadd.f32 2.0, %v743_v16  ;;  %v745_v20 = vmul.f32 %v743_v16, %v731_v5 }
 0x472   :  { %1382 = vrcp.f32 %v747_v17 }
 0x47a   :  { %v1381_v18 = vpop.eup %1380 }
 0x47b   :  { %v750_v22 = vmul.f32 %v1381_v18, %v744_v19 }
 0x47c   :  { %v1383_v21 = vpop.eup %1382 }
 0x47d   :  { %v751_v23 = vmul.f32 %v1383_v21, %v745_v20 }
 0x47f   :  { %v768_v24 = vpack.c.bf16 %v751_v23, %v750_v22 }
 0x481   :  { %1267 = vmatmul.mubr.bf16.vlgmr.msra.gmra.mrb[8].mxu1 %v768_v24 }
 0x554   :  { %v855_v37 = vpop.f32.mrb[8].mxu1 }
 0x555   :  { %v856_v38 = vadd.f32 %v855_v37, %v772_v36  ;;  %v1268_v39 = vpop.f32.mrb[9].mxu1 }
 0x556   :  { %v858_v40 = vpop.f32.mrb[10].mxu1 }
 0x557   :  { %v862_v41 = vmin.f32 %v856_v38, 20.0  ;;  %v859_v42 = vadd.f32 %v858_v40, %v772_v36  ;;  %v1269_v43 = vpop.f32.mrb[11].mxu1 }
 0x559   :  { %v864_v44 = vmul.f32 1.442695, %v862_v41  ;;  %v863_v45 = vmin.f32 %v859_v42, 20.0 }
 0x55b   :  { %1384 = vpow2.f32 %v864_v44  ;;  %v866_v46 = vmul.f32 1.442695, %v863_v45 }
 0x55d   :  { %1386 = vpow2.f32 %v866_v46 }
 0x565   :  { %v1385_v47 = vpop.eup %1384 }
 0x566   :  { %v868_v0 = vadd.f32 2.0, %v1385_v47 }
 0x567   :  { %v1387_v48 = vpop.eup %1386 }
 0x568   :  { %v870_v49 = vmul.f32 %v1385_v47, %v868_v0  ;;  %v869_v50 = vadd.f32 2.0, %v1387_v48 }
 0x56a   :  { %v874_v51 = vadd.f32 2.0, %v870_v49  ;;  %v871_v52 = vmul.f32 %v1387_v48, %v869_v50  ;;  %v872_v55 = vmul.f32 %v870_v49, %v856_v38 }
 0x56c   :  { %1388 = vrcp.f32 %v874_v51  ;;  %v875_v53 = vadd.f32 2.0, %v871_v52  ;;  %v873_v56 = vmul.f32 %v871_v52, %v859_v42 }
 0x56e   :  { %1390 = vrcp.f32 %v875_v53 }
 0x576   :  { %v1389_v54 = vpop.eup %1388 }
 0x577   :  { %v878_v58 = vmul.f32 %v1389_v54, %v872_v55 }
 0x578   :  { %v1391_v57 = vpop.eup %1390 }
 0x579   :  { %v879_v59 = vmul.f32 %v1391_v57, %v873_v56 }
 0x57b   :  { %v896_v60 = vpack.c.bf16 %v879_v59, %v878_v58 }
 0x57d   :  { %1287 = vmatmul.mubr.bf16.vlgmr.msra.gmra.mrb[12].mxu0 %v896_v60 }
 0x650   :  { %v983_v63 = vpop.f32.mrb[12].mxu0 }
 0x651   :  { %v1288_v1 = vpop.f32.mrb[13].mxu0  ;;  %v984_v3 = vadd.f32 %v983_v63, %v900_v62 }
 0x652   :  { %v986_v2 = vpop.f32.mrb[14].mxu0 }
 0x653   :  { %v987_v4 = vadd.f32 %v986_v2, %v900_v62  ;;  %v1289_v5 = vpop.f32.mrb[15].mxu0 }
 0x655   :  { %v1085_v6 = vpack.c.bf16 %v987_v4, %v984_v3 }
 0x657   :  { %1086 = vst [vmem:[#allocation16] sm:$0xff] %v1085_v6  }
 0x658   :  { %1579 = shalt.err (!%p1576_p12)
}
 0x659   :  { %s1580_s23 = scalar_lea.hbm %s1930_s9, 128 }
 0x65a   :  { %p1581_p13 = scmp.ne.s32.totalorder %s1930_s9, %s1580_s23  ;;  %p1584_p0 = scmp.lt.u32.totalorder %s1580_s23, %s1930_s9 }
 0x65c   :  { %p1586_p1 = pnand %p1584_p0, %p1581_p13 }
 0x65e   :  { %1589 = shalt.err (!%p1586_p1)
}
 0x65f   :  { %1011 = dma.vmem_to_hbm [thread:$0]  %s1006_s15, 128, %s1930_s9, [#allocation4], %s1604_s21, %s1604_s21, %s1605_s22  }
 0x660   :  { %1600 = dma.done.wait [#allocation4], 128  }
 0x661   :  { %1601 = vsyncadd [#allocation4], 4294967168 }
 0x662   :  { %1015 = vsyncpa [#allocation3], 1 }
 0x663   :  { %1016 = vsyncpa [#allocation6], 1 }
 0x664   :  { %1017 = vsyncpa [#allocation9], 1 }
 0x665   :  { %1018 = vsyncpa [#allocation12], 1 }
 0x666   :  { %1019 = vsyncpa [#allocation15], 1 }
 0x667   :  { %1020 = vsyncpa [#allocation4], 1 }

</bundles_post_ra>
